<compile_context>
chip_gen: v5e
topology: v5e:2x2
jax: 0.10.0
libtpu: 0.0.40
codegen_flags: <defaults>
</compile_context>

<pallas_src>
from functools import lru_cache

import jax
import jax.numpy as jnp
from jax import lax
from jax.experimental import pallas as pl
from jax.experimental.pallas import tpu as pltpu


# --------------------------------------------------------------------------
# Small helpers
# --------------------------------------------------------------------------

def _round_up(n, m):
    return ((n + m - 1) // m) * m


def _cdiv(a, b):
    return (a + b - 1) // b


@lru_cache(maxsize=None)
def _tpu_budget():
    """(conv_tile_rows, tail_tile_rows, vmem_limit_bytes) per TPU generation.

    v5e/v6e have 128 MiB VMEM -> large tiles amortize the ~0.35us/grid-step
    overhead; v7x has only 64 MiB -> cap tiles and the scoped-VMEM request.
    """
    try:
        vmem = pltpu.get_tpu_info().vmem_capacity_bytes
    except Exception:
        vmem = 64 << 20                       # conservative fallback
    if vmem >= (100 << 20):                   # v5e / v6e
        return 4096, 512, 64 << 20
    return 2048, 256, 32 << 20                # v7x (64 MiB VMEM)


def _pick_tile(n_rows, max_tile):
    """Rows per grid step: multiple of 8, <= max_tile, and <= ceil(N/2) so the
    1-D grid has length >= 2 whenever possible (both v7x TensorCores get work)."""
    half = _round_up(_cdiv(n_rows, 2), 8)
    return max(8, min(max_tile, half))


# --------------------------------------------------------------------------
# Pallas kernels
# --------------------------------------------------------------------------

def conv_pool_relu_kernel(p_ref, w_ref, b_ref, o_ref):
    """Fused conv-as-matmul + 2x2 maxpool + bias + ReLU for one row tile.

    p_ref : [tn, Kp]    bf16  pooled-window patches (one row per pooled pixel)
    w_ref : [4, Kp, C]  bf16  conv weight embedded at each of the 4 pool taps
    b_ref : [1, C]      f32
    o_ref : [tn, C]     bf16
    """
    p = p_ref[...]
    m = None
    for t in range(4):                              # MXU is <1% utilized anyway
        y = jnp.dot(p, w_ref[t], preferred_element_type=jnp.float32)
        m = y if m is None else jnp.maximum(m, y)
    # max-then-(bias+relu) == relu(maxpool(conv+bias)): bias is per-channel and
    # ReLU is monotonic.
    o_ref[...] = jnp.maximum(m + b_ref[...], 0.0).astype(o_ref.dtype)


def tail_kernel(p_ref, w3_ref, b3_ref, w4_ref, b4_ref, w5_ref, b5_ref,
                w6_ref, b6_ref, o_ref):
    """Fused tail for one batch tile: conv3(3x3)+pool+relu -> conv4(1x1)+relu
    -> fc1+relu -> (dropout=id) -> fc2 + log_softmax.  Stays in VMEM/vregs.

    p_ref  : [tb, 320] bf16   layer-2 activations, (h, w, c)-flattened
    w3_ref : [4, 320, 40] bf16 pool-tap embedded conv3 weights
    o_ref  : [tb, 10] f32 log-probs
    """
    f32 = jnp.float32
    p = p_ref[...]
    m = None
    for t in range(4):
        y = jnp.dot(p, w3_ref[t], preferred_element_type=f32)       # [tb, 40]
        m = y if m is None else jnp.maximum(m, y)
    x3 = jnp.maximum(m + b3_ref[...], 0.0)                          # [tb, 40]
    x4 = jnp.maximum(
        jnp.dot(x3.astype(w4_ref.dtype), w4_ref[...],
                preferred_element_type=f32) + b4_ref[...], 0.0)     # [tb, 80]
    x5 = jnp.maximum(
        jnp.dot(x4.astype(w5_ref.dtype), w5_ref[...],
                preferred_element_type=f32) + b5_ref[...], 0.0)     # [tb, 50]
    y6 = jnp.dot(x5.astype(w6_ref.dtype), w6_ref[...],
                 preferred_element_type=f32) + b6_ref[...]          # [tb, 10]
    s = y6 - jnp.max(y6, axis=-1, keepdims=True)
    o_ref[...] = s - jnp.log(jnp.sum(jnp.exp(s), axis=-1, keepdims=True))


# --------------------------------------------------------------------------
# Pallas wrappers
# --------------------------------------------------------------------------

def pallas_conv_pool_relu(p, w_taps, bias):
    """p: [N, Kp] pooled-window patches -> [N, C] pooled + ReLU'd activations."""
    n, kp = p.shape
    c = w_taps.shape[-1]
    conv_tile, _, vmem_limit = _tpu_budget()

    p = p.astype(jnp.bfloat16)
    w_taps = w_taps.astype(jnp.bfloat16)
    bias = bias.astype(jnp.float32)

    tn = _pick_tile(n, conv_tile)
    n_pad = _round_up(n, tn)
    if n_pad != n:
        p = jnp.pad(p, ((0, n_pad - n), (0, 0)))

    out = pl.pallas_call(
        conv_pool_relu_kernel,
        out_shape=jax.ShapeDtypeStruct((n_pad, c), jnp.bfloat16),
        grid_spec=pltpu.PrefetchScalarGridSpec(
            num_scalar_prefetch=0,
            grid=(n_pad // tn,),
            in_specs=[
                pl.BlockSpec((tn, kp), lambda i: (i, 0)),
                pl.BlockSpec((4, kp, c), lambda i: (0, 0, 0)),   # fetched once
                pl.BlockSpec((1, c), lambda i: (0, 0)),
            ],
            out_specs=pl.BlockSpec((tn, c), lambda i: (i, 0)),
        ),
        compiler_params=pltpu.CompilerParams(
            dimension_semantics=("parallel",),
            vmem_limit_bytes=vmem_limit),
    )(p, w_taps, bias)
    return out[:n]


def pallas_fused_tail(p3, w3_taps, params, batch):
    """p3: [B, 320] layer-2 activations -> [B, 10] f32 log-probs (batch-tiled)."""
    _, tail_tile, vmem_limit = _tpu_budget()
    tb = _pick_tile(batch, tail_tile)
    b_pad = _round_up(batch, tb)

    p = p3.astype(jnp.bfloat16)
    if b_pad != batch:
        p = jnp.pad(p, ((0, b_pad - batch), (0, 0)))

    bf = lambda a: a.astype(jnp.bfloat16)
    f32 = lambda a: a.astype(jnp.float32)

    def const(shape):
        return pl.BlockSpec(shape, lambda i: (0,) * len(shape))

    out = pl.pallas_call(
        tail_kernel,
        out_shape=jax.ShapeDtypeStruct((b_pad, 10), jnp.float32),
        grid_spec=pltpu.PrefetchScalarGridSpec(
            num_scalar_prefetch=0,
            grid=(b_pad // tb,),
            in_specs=[
                pl.BlockSpec((tb, 320), lambda i: (i, 0)),
                const((4, 320, 40)), const((1, 40)),
                const((40, 80)), const((1, 80)),
                const((80, 50)), const((1, 50)),
                const((50, 10)), const((1, 10)),
            ],
            out_specs=pl.BlockSpec((tb, 10), lambda i: (i, 0)),
        ),
        compiler_params=pltpu.CompilerParams(
            dimension_semantics=("parallel",),
            vmem_limit_bytes=vmem_limit),
    )(p,
      bf(w3_taps), f32(params["b3"]),
      bf(params["w4"].reshape(40, 80)), f32(params["b4"]),
      bf(params["w5"]), f32(params["b5"]),
      bf(params["w6"]), f32(params["b6"]))
    return out[:batch]


# --------------------------------------------------------------------------
# Glue: fused conv+pool patch extraction + pool-tap weight embedding
# --------------------------------------------------------------------------

def _pooled_patches(x, ksize):
    """x: [B,H,W,C] -> [B, PH, PW, (k+1)^2*C].  One fused XLA op extracting the
    (k+1)x(k+1) stride-2 window that covers every input needed for a k x k conv
    followed by a 2x2/2 maxpool at each pooled output position."""
    ek = ksize + 1
    return lax.conv_general_dilated_patches(
        x, (ek, ek), (2, 2), 'VALID',
        dimension_numbers=('NHWC', 'HWIO', 'NHWC'))


def _patch_feature_perm(ek, cin):
    """Permutation mapping conv_general_dilated_patches' feature ordering to a
    row-major (ki, kj, cin) flattening — probed, so it can never silently drift."""
    probe = jnp.arange(ek * ek * cin, dtype=jnp.float32).reshape(1, ek, ek, cin)
    flat = lax.conv_general_dilated_patches(
        probe, (ek, ek), (1, 1), 'VALID',
        dimension_numbers=('NHWC', 'HWIO', 'NHWC'))
    return flat.reshape(ek * ek * cin).astype(jnp.int32)


def _pool_tap_weights(w, feature_perm=None):
    """w: [KH, KW, Cin, Cout] -> [4, (KH+1)*(KW+1)*Cin, Cout]: the conv weight
    zero-embedded at each 2x2 pool-tap offset inside the pooled patch window.
    Row order is (ki, kj, cin), optionally re-permuted to `feature_perm`."""
    kh, kw, cin, cout = w.shape
    ekh, ekw = kh + 1, kw + 1
    taps = []
    for di in range(2):
        for dj in range(2):
            e = jnp.zeros((ekh, ekw, cin, cout), w.dtype)
            e = e.at[di:di + kh, dj:dj + kw].set(w)
            taps.append(e.reshape(ekh * ekw * cin, cout))
    t = jnp.stack(taps)                          # [4, EK*EK*Cin, Cout]
    if feature_perm is not None:
        t = jnp.take(t, feature_perm, axis=1)
    return t


# --------------------------------------------------------------------------
# Model: deterministic parameter init + forward
# --------------------------------------------------------------------------

def init_params(key):
    def nrm(k, shape, fan_in):
        return jax.random.normal(k, shape, jnp.float32) / jnp.sqrt(float(fan_in))

    ks = jax.random.split(key, 12)
    return {
        # conv weights stored as [KH, KW, Cin, Cout]
        "w1": nrm(ks[0], (5, 5, 1, 10), 25),    "b1": nrm(ks[1], (1, 10), 25),
        "w2": nrm(ks[2], (5, 5, 10, 20), 250),  "b2": nrm(ks[3], (1, 20), 250),
        "w3": nrm(ks[4], (3, 3, 20, 40), 180),  "b3": nrm(ks[5], (1, 40), 180),
        "w4": nrm(ks[6], (1, 1, 40, 80), 40),   "b4": nrm(ks[7], (1, 80), 40),
        # fc weights stored as [in, out]
        "w5": nrm(ks[8], (80, 50), 80),         "b5": nrm(ks[9], (1, 50), 80),
        "w6": nrm(ks[10], (50, 10), 50),        "b6": nrm(ks[11], (1, 10), 50),
    }


def cnn_forward(params, x_nchw):
    """x_nchw: [B, 1, 28, 28] float32  ->  [B, 10] float32 log-probs (eval mode)."""
    b = x_nchw.shape[0]
    x = jnp.transpose(x_nchw, (0, 2, 3, 1)).astype(jnp.bfloat16)       # NHWC

    # layer 1: relu(maxpool2(conv1(x)))
    p1 = _pooled_patches(x, 5).reshape(b * 12 * 12, 36)
    w1t = _pool_tap_weights(params["w1"], _patch_feature_perm(6, 1))
    x1 = pallas_conv_pool_relu(p1, w1t, params["b1"]).reshape(b, 12, 12, 10)

    # layer 2: relu(maxpool2(dropout2d(conv2(x))))   (dropout2d = identity, eval)
    p2 = _pooled_patches(x1, 5).reshape(b * 4 * 4, 360)
    w2t = _pool_tap_weights(params["w2"], _patch_feature_perm(6, 10))
    x2 = pallas_conv_pool_relu(p2, w2t, params["b2"]).reshape(b, 4, 4, 20)

    # fused tail: conv3+pool+relu -> conv4(1x1)+relu -> view(-1,80) -> fc1+relu
    #             -> dropout(identity) -> fc2 + log_softmax.
    # conv3's pooled output is 1x1 spatial, so its "pooled patch" is just the
    # whole 4x4x20 map: no extra HBM materialization for layer 3.
    p3 = x2.reshape(b, 4 * 4 * 20)
    w3t = _pool_tap_weights(params["w3"])            # (ki, kj, cin) row order
    return pallas_fused_tail(p3, w3t, params, b)     # [B, 10]


def reference_forward(params, x_nchw):
    """Pure-XLA reference (lax convs) with matching bf16 cast points."""
    bf16 = jnp.bfloat16
    dn = ('NHWC', 'HWIO', 'NHWC')

    def conv(v, w):
        return lax.conv_general_dilated(
            v.astype(bf16), w.astype(bf16), (1, 1), 'VALID',
            dimension_numbers=dn, preferred_element_type=jnp.float32)

    def pool2(v):
        return lax.reduce_window(v, -jnp.inf, lax.max,
                                 (1, 2, 2, 1), (1, 2, 2, 1), 'VALID')

    relu = lambda v: jnp.maximum(v, 0.0)
    x = jnp.transpose(x_nchw, (0, 2, 3, 1))
    x = relu(pool2(conv(x, params["w1"]) + params["b1"]))
    x = relu(pool2(conv(x, params["w2"]) + params["b2"]))
    x = relu(pool2(conv(x, params["w3"]) + params["b3"]))
    x = relu(conv(x, params["w4"]) + params["b4"])
    x = x.reshape(x.shape[0], 80)
    x = relu(jnp.dot(x.astype(bf16), params["w5"].astype(bf16),
                     preferred_element_type=jnp.float32) + params["b5"])
    x = jnp.dot(x.astype(bf16), params["w6"].astype(bf16),
                preferred_element_type=jnp.float32) + params["b6"]
    return jax.nn.log_softmax(x, axis=-1)


# --------------------------------------------------------------------------
# Main
# --------------------------------------------------------------------------

if __name__ == "__main__":
    key = jax.random.PRNGKey(0)
    k_x, k_p = jax.random.split(key)

    # PyTorch-convention input: NCHW, 28x28 (required so the trunk reaches 1x1
    # spatial and view(-1, 80) is valid).
    x = jax.random.normal(k_x, (2, 1, 28, 28), jnp.float32)
    params = init_params(k_p)

    fwd = jax.jit(cnn_forward)
    logp = jax.block_until_ready(fwd(params, x))

    assert logp.shape == (2, 10)
    assert logp.dtype == jnp.float32
    # log_softmax rows must (approximately) exponentiate-sum to 1
    row_sums = jnp.sum(jnp.exp(logp), axis=1)
    assert bool(jnp.all(jnp.abs(row_sums - 1.0) < 1e-4))

    # validate against a pure-XLA reference with matching bf16 cast points
    ref = jax.block_until_ready(jax.jit(reference_forward)(params, x))
    assert bool(jnp.max(jnp.abs(logp - ref)) < 5e-2)

    print("KERNEL_OK")
</pallas_src>

<mosaic_0001>
module attributes {stable_mosaic.version = 11 : i64} {
  func.func @conv_pool_relu_kernel(%arg0: i32, %arg1: memref<144x36xbf16, #tpu.memory_space<vmem>>, %arg2: memref<4x36x10xbf16, #tpu.memory_space<vmem>>, %arg3: memref<1x10xf32, #tpu.memory_space<vmem>>, %arg4: memref<144x10xbf16, #tpu.memory_space<vmem>>) attributes {dimension_semantics = [#tpu.dimension_semantics<parallel>], iteration_bounds = array<i64: 2>, scalar_prefetch = 0 : i64, scratch_operands = 0 : i64, tpu.core_type = #tpu.core_type<tc>, window_params = [{transform_indices = @transform_0, window_bounds = array<i64: 144, 36>}, {pipeline_mode = #tpu.pipeline_mode<synchronous>, transform_indices = @transform_1, window_bounds = array<i64: 4, 36, 10>}, {pipeline_mode = #tpu.pipeline_mode<synchronous>, transform_indices = @transform_2, window_bounds = array<i64: 1, 10>}, {transform_indices = @transform_3, window_bounds = array<i64: 144, 10>}]} {
    %c0 = arith.constant 0 : index
    %c0_0 = arith.constant 0 : index
    %0 = vector.load %arg1[%c0, %c0_0] : memref<144x36xbf16, #tpu.memory_space<vmem>>, vector<144x36xbf16>
    %c0_1 = arith.constant 0 : index
    %c0_2 = arith.constant 0 : index
    %c0_3 = arith.constant 0 : index
    %1 = vector.load %arg2[%c0_1, %c0_2, %c0_3] : memref<4x36x10xbf16, #tpu.memory_space<vmem>>, vector<1x36x10xbf16>
    %2 = vector.shape_cast %1 : vector<1x36x10xbf16> to vector<36x10xbf16>
    %cst = arith.constant dense<0.000000e+00> : vector<144x10xf32>
    %3 = tpu.matmul %0, %2, %cst {dimension_numbers = #tpu.dot_dimension_numbers<[1], [0], [0], [1], [0, 0, 1, 1], [], []>} : vector<144x36xbf16>, vector<36x10xbf16>, vector<144x10xf32> -> vector<144x10xf32>
    %c1 = arith.constant 1 : index
    %c0_4 = arith.constant 0 : index
    %c0_5 = arith.constant 0 : index
    %4 = vector.load %arg2[%c1, %c0_4, %c0_5] : memref<4x36x10xbf16, #tpu.memory_space<vmem>>, vector<1x36x10xbf16>
    %5 = vector.shape_cast %4 : vector<1x36x10xbf16> to vector<36x10xbf16>
    %cst_6 = arith.constant dense<0.000000e+00> : vector<144x10xf32>
    %6 = tpu.matmul %0, %5, %cst_6 {dimension_numbers = #tpu.dot_dimension_numbers<[1], [0], [0], [1], [0, 0, 1, 1], [], []>} : vector<144x36xbf16>, vector<36x10xbf16>, vector<144x10xf32> -> vector<144x10xf32>
    %7 = arith.maximumf %3, %6 : vector<144x10xf32>
    %c2 = arith.constant 2 : index
    %c0_7 = arith.constant 0 : index
    %c0_8 = arith.constant 0 : index
    %8 = vector.load %arg2[%c2, %c0_7, %c0_8] : memref<4x36x10xbf16, #tpu.memory_space<vmem>>, vector<1x36x10xbf16>
    %9 = vector.shape_cast %8 : vector<1x36x10xbf16> to vector<36x10xbf16>
    %cst_9 = arith.constant dense<0.000000e+00> : vector<144x10xf32>
    %10 = tpu.matmul %0, %9, %cst_9 {dimension_numbers = #tpu.dot_dimension_numbers<[1], [0], [0], [1], [0, 0, 1, 1], [], []>} : vector<144x36xbf16>, vector<36x10xbf16>, vector<144x10xf32> -> vector<144x10xf32>
    %11 = arith.maximumf %7, %10 : vector<144x10xf32>
    %c3 = arith.constant 3 : index
    %c0_10 = arith.constant 0 : index
    %c0_11 = arith.constant 0 : index
    %12 = vector.load %arg2[%c3, %c0_10, %c0_11] : memref<4x36x10xbf16, #tpu.memory_space<vmem>>, vector<1x36x10xbf16>
    %13 = vector.shape_cast %12 : vector<1x36x10xbf16> to vector<36x10xbf16>
    %cst_12 = arith.constant dense<0.000000e+00> : vector<144x10xf32>
    %14 = tpu.matmul %0, %13, %cst_12 {dimension_numbers = #tpu.dot_dimension_numbers<[1], [0], [0], [1], [0, 0, 1, 1], [], []>} : vector<144x36xbf16>, vector<36x10xbf16>, vector<144x10xf32> -> vector<144x10xf32>
    %15 = arith.maximumf %11, %14 : vector<144x10xf32>
    %c0_13 = arith.constant 0 : index
    %c0_14 = arith.constant 0 : index
    %16 = vector.load %arg3[%c0_13, %c0_14] : memref<1x10xf32, #tpu.memory_space<vmem>>, vector<1x10xf32>
    %17 = vector.broadcast %16 : vector<1x10xf32> to vector<144x10xf32>
    %18 = arith.addf %15, %17 : vector<144x10xf32>
    %cst_15 = arith.constant 0.000000e+00 : f32
    %19 = vector.broadcast %cst_15 : f32 to vector<144x10xf32>
    %20 = arith.maximumf %18, %19 : vector<144x10xf32>
    %21 = arith.truncf %20 : vector<144x10xf32> to vector<144x10xbf16>
    %c0_16 = arith.constant 0 : index
    %c0_17 = arith.constant 0 : index
    %22 = vector.load %arg4[%c0_16, %c0_17] : memref<144x10xbf16, #tpu.memory_space<vmem>>, vector<144x10xbf16>
    tpu.vector_store %arg4[%c0_16, %c0_17], %21 {strides = array<i32>} : memref<144x10xbf16, #tpu.memory_space<vmem>>, vector<144x10xbf16>,
    return
  }
  func.func @transform_0(%arg0: i32) -> (i32, i32) {
    %c0_i32 = arith.constant 0 : i32
    %c0_i32_0 = arith.constant 0 : i32
    return %arg0, %c0_i32 : i32, i32
  }
  func.func @transform_1(%arg0: i32) -> (i32, i32, i32) {
    %c0_i32 = arith.constant 0 : i32
    %c0_i32_0 = arith.constant 0 : i32
    %c0_i32_1 = arith.constant 0 : i32
    %c0_i32_2 = arith.constant 0 : i32
    return %c0_i32, %c0_i32_0, %c0_i32_1 : i32, i32, i32
  }
  func.func @transform_2(%arg0: i32) -> (i32, i32) {
    %c0_i32 = arith.constant 0 : i32
    %c0_i32_0 = arith.constant 0 : i32
    %c0_i32_1 = arith.constant 0 : i32
    return %c0_i32, %c0_i32_0 : i32, i32
  }
  func.func @transform_3(%arg0: i32) -> (i32, i32) {
    %c0_i32 = arith.constant 0 : i32
    %c0_i32_0 = arith.constant 0 : i32
    return %arg0, %c0_i32 : i32, i32
  }
}

module attributes {stable_mosaic.version = 11 : i64} {
  func.func @conv_pool_relu_kernel(%arg0: i32, %arg1: memref<16x360xbf16, #tpu.memory_space<vmem>>, %arg2: memref<4x360x20xbf16, #tpu.memory_space<vmem>>, %arg3: memref<1x20xf32, #tpu.memory_space<vmem>>, %arg4: memref<16x20xbf16, #tpu.memory_space<vmem>>) attributes {dimension_semantics = [#tpu.dimension_semantics<parallel>], iteration_bounds = array<i64: 2>, scalar_prefetch = 0 : i64, scratch_operands = 0 : i64, tpu.core_type = #tpu.core_type<tc>, window_params = [{transform_indices = @transform_0, window_bounds = array<i64: 16, 360>}, {pipeline_mode = #tpu.pipeline_mode<synchronous>, transform_indices = @transform_1, window_bounds = array<i64: 4, 360, 20>}, {pipeline_mode = #tpu.pipeline_mode<synchronous>, transform_indices = @transform_2, window_bounds = array<i64: 1, 20>}, {transform_indices = @transform_3, window_bounds = array<i64: 16, 20>}]} {
    %c0 = arith.constant 0 : index
    %c0_0 = arith.constant 0 : index
    %0 = vector.load %arg1[%c0, %c0_0] : memref<16x360xbf16, #tpu.memory_space<vmem>>, vector<16x360xbf16>
    %c0_1 = arith.constant 0 : index
    %c0_2 = arith.constant 0 : index
    %c0_3 = arith.constant 0 : index
    %1 = vector.load %arg2[%c0_1, %c0_2, %c0_3] : memref<4x360x20xbf16, #tpu.memory_space<vmem>>, vector<1x360x20xbf16>
    %2 = vector.shape_cast %1 : vector<1x360x20xbf16> to vector<360x20xbf16>
    %cst = arith.constant dense<0.000000e+00> : vector<16x20xf32>
    %3 = tpu.matmul %0, %2, %cst {dimension_numbers = #tpu.dot_dimension_numbers<[1], [0], [0], [1], [0, 0, 1, 1], [], []>} : vector<16x360xbf16>, vector<360x20xbf16>, vector<16x20xf32> -> vector<16x20xf32>
    %c1 = arith.constant 1 : index
    %c0_4 = arith.constant 0 : index
    %c0_5 = arith.constant 0 : index
    %4 = vector.load %arg2[%c1, %c0_4, %c0_5] : memref<4x360x20xbf16, #tpu.memory_space<vmem>>, vector<1x360x20xbf16>
    %5 = vector.shape_cast %4 : vector<1x360x20xbf16> to vector<360x20xbf16>
    %cst_6 = arith.constant dense<0.000000e+00> : vector<16x20xf32>
    %6 = tpu.matmul %0, %5, %cst_6 {dimension_numbers = #tpu.dot_dimension_numbers<[1], [0], [0], [1], [0, 0, 1, 1], [], []>} : vector<16x360xbf16>, vector<360x20xbf16>, vector<16x20xf32> -> vector<16x20xf32>
    %7 = arith.maximumf %3, %6 : vector<16x20xf32>
    %c2 = arith.constant 2 : index
    %c0_7 = arith.constant 0 : index
    %c0_8 = arith.constant 0 : index
    %8 = vector.load %arg2[%c2, %c0_7, %c0_8] : memref<4x360x20xbf16, #tpu.memory_space<vmem>>, vector<1x360x20xbf16>
    %9 = vector.shape_cast %8 : vector<1x360x20xbf16> to vector<360x20xbf16>
    %cst_9 = arith.constant dense<0.000000e+00> : vector<16x20xf32>
    %10 = tpu.matmul %0, %9, %cst_9 {dimension_numbers = #tpu.dot_dimension_numbers<[1], [0], [0], [1], [0, 0, 1, 1], [], []>} : vector<16x360xbf16>, vector<360x20xbf16>, vector<16x20xf32> -> vector<16x20xf32>
    %11 = arith.maximumf %7, %10 : vector<16x20xf32>
    %c3 = arith.constant 3 : index
    %c0_10 = arith.constant 0 : index
    %c0_11 = arith.constant 0 : index
    %12 = vector.load %arg2[%c3, %c0_10, %c0_11] : memref<4x360x20xbf16, #tpu.memory_space<vmem>>, vector<1x360x20xbf16>
    %13 = vector.shape_cast %12 : vector<1x360x20xbf16> to vector<360x20xbf16>
    %cst_12 = arith.constant dense<0.000000e+00> : vector<16x20xf32>
    %14 = tpu.matmul %0, %13, %cst_12 {dimension_numbers = #tpu.dot_dimension_numbers<[1], [0], [0], [1], [0, 0, 1, 1], [], []>} : vector<16x360xbf16>, vector<360x20xbf16>, vector<16x20xf32> -> vector<16x20xf32>
    %15 = arith.maximumf %11, %14 : vector<16x20xf32>
    %c0_13 = arith.constant 0 : index
    %c0_14 = arith.constant 0 : index
    %16 = vector.load %arg3[%c0_13, %c0_14] : memref<1x20xf32, #tpu.memory_space<vmem>>, vector<1x20xf32>
    %17 = vector.broadcast %16 : vector<1x20xf32> to vector<16x20xf32>
    %18 = arith.addf %15, %17 : vector<16x20xf32>
    %cst_15 = arith.constant 0.000000e+00 : f32
    %19 = vector.broadcast %cst_15 : f32 to vector<16x20xf32>
    %20 = arith.maximumf %18, %19 : vector<16x20xf32>
    %21 = arith.truncf %20 : vector<16x20xf32> to vector<16x20xbf16>
    %c0_16 = arith.constant 0 : index
    %c0_17 = arith.constant 0 : index
    %22 = vector.load %arg4[%c0_16, %c0_17] : memref<16x20xbf16, #tpu.memory_space<vmem>>, vector<16x20xbf16>
    tpu.vector_store %arg4[%c0_16, %c0_17], %21 {strides = array<i32>} : memref<16x20xbf16, #tpu.memory_space<vmem>>, vector<16x20xbf16>,
    return
  }
  func.func @transform_0(%arg0: i32) -> (i32, i32) {
    %c0_i32 = arith.constant 0 : i32
    %c0_i32_0 = arith.constant 0 : i32
    return %arg0, %c0_i32 : i32, i32
  }
  func.func @transform_1(%arg0: i32) -> (i32, i32, i32) {
    %c0_i32 = arith.constant 0 : i32
    %c0_i32_0 = arith.constant 0 : i32
    %c0_i32_1 = arith.constant 0 : i32
    %c0_i32_2 = arith.constant 0 : i32
    return %c0_i32, %c0_i32_0, %c0_i32_1 : i32, i32, i32
  }
  func.func @transform_2(%arg0: i32) -> (i32, i32) {
    %c0_i32 = arith.constant 0 : i32
    %c0_i32_0 = arith.constant 0 : i32
    %c0_i32_1 = arith.constant 0 : i32
    return %c0_i32, %c0_i32_0 : i32, i32
  }
  func.func @transform_3(%arg0: i32) -> (i32, i32) {
    %c0_i32 = arith.constant 0 : i32
    %c0_i32_0 = arith.constant 0 : i32
    return %arg0, %c0_i32 : i32, i32
  }
}

module attributes {stable_mosaic.version = 11 : i64} {
  func.func @tail_kernel(%arg0: i32, %arg1: memref<8x320xbf16, #tpu.memory_space<vmem>>, %arg2: memref<4x320x40xbf16, #tpu.memory_space<vmem>>, %arg3: memref<1x40xf32, #tpu.memory_space<vmem>>, %arg4: memref<40x80xbf16, #tpu.memory_space<vmem>>, %arg5: memref<1x80xf32, #tpu.memory_space<vmem>>, %arg6: memref<80x50xbf16, #tpu.memory_space<vmem>>, %arg7: memref<1x50xf32, #tpu.memory_space<vmem>>, %arg8: memref<50x10xbf16, #tpu.memory_space<vmem>>, %arg9: memref<1x10xf32, #tpu.memory_space<vmem>>, %arg10: memref<8x10xf32, #tpu.memory_space<vmem>>) attributes {dimension_semantics = [#tpu.dimension_semantics<parallel>], iteration_bounds = array<i64: 1>, scalar_prefetch = 0 : i64, scratch_operands = 0 : i64, tpu.core_type = #tpu.core_type<tc>, window_params = [{transform_indices = @transform_0, window_bounds = array<i64: 8, 320>}, {pipeline_mode = #tpu.pipeline_mode<synchronous>, transform_indices = @transform_1, window_bounds = array<i64: 4, 320, 40>}, {pipeline_mode = #tpu.pipeline_mode<synchronous>, transform_indices = @transform_2, window_bounds = array<i64: 1, 40>}, {pipeline_mode = #tpu.pipeline_mode<synchronous>, transform_indices = @transform_3, window_bounds = array<i64: 40, 80>}, {pipeline_mode = #tpu.pipeline_mode<synchronous>, transform_indices = @transform_4, window_bounds = array<i64: 1, 80>}, {pipeline_mode = #tpu.pipeline_mode<synchronous>, transform_indices = @transform_5, window_bounds = array<i64: 80, 50>}, {pipeline_mode = #tpu.pipeline_mode<synchronous>, transform_indices = @transform_6, window_bounds = array<i64: 1, 50>}, {pipeline_mode = #tpu.pipeline_mode<synchronous>, transform_indices = @transform_7, window_bounds = array<i64: 50, 10>}, {pipeline_mode = #tpu.pipeline_mode<synchronous>, transform_indices = @transform_8, window_bounds = array<i64: 1, 10>}, {transform_indices = @transform_9, window_bounds = array<i64: 8, 10>}]} {
    %c0 = arith.constant 0 : index
    %c0_0 = arith.constant 0 : index
    %0 = vector.load %arg1[%c0, %c0_0] : memref<8x320xbf16, #tpu.memory_space<vmem>>, vector<8x320xbf16>
    %c0_1 = arith.constant 0 : index
    %c0_2 = arith.constant 0 : index
    %c0_3 = arith.constant 0 : index
    %1 = vector.load %arg2[%c0_1, %c0_2, %c0_3] : memref<4x320x40xbf16, #tpu.memory_space<vmem>>, vector<1x320x40xbf16>
    %2 = vector.shape_cast %1 : vector<1x320x40xbf16> to vector<320x40xbf16>
    %cst = arith.constant dense<0.000000e+00> : vector<8x40xf32>
    %3 = tpu.matmul %0, %2, %cst {dimension_numbers = #tpu.dot_dimension_numbers<[1], [0], [0], [1], [0, 0, 1, 1], [], []>} : vector<8x320xbf16>, vector<320x40xbf16>, vector<8x40xf32> -> vector<8x40xf32>
    %c1 = arith.constant 1 : index
    %c0_4 = arith.constant 0 : index
    %c0_5 = arith.constant 0 : index
    %4 = vector.load %arg2[%c1, %c0_4, %c0_5] : memref<4x320x40xbf16, #tpu.memory_space<vmem>>, vector<1x320x40xbf16>
    %5 = vector.shape_cast %4 : vector<1x320x40xbf16> to vector<320x40xbf16>
    %cst_6 = arith.constant dense<0.000000e+00> : vector<8x40xf32>
    %6 = tpu.matmul %0, %5, %cst_6 {dimension_numbers = #tpu.dot_dimension_numbers<[1], [0], [0], [1], [0, 0, 1, 1], [], []>} : vector<8x320xbf16>, vector<320x40xbf16>, vector<8x40xf32> -> vector<8x40xf32>
    %7 = arith.maximumf %3, %6 : vector<8x40xf32>
    %c2 = arith.constant 2 : index
    %c0_7 = arith.constant 0 : index
    %c0_8 = arith.constant 0 : index
    %8 = vector.load %arg2[%c2, %c0_7, %c0_8] : memref<4x320x40xbf16, #tpu.memory_space<vmem>>, vector<1x320x40xbf16>
    %9 = vector.shape_cast %8 : vector<1x320x40xbf16> to vector<320x40xbf16>
    %cst_9 = arith.constant dense<0.000000e+00> : vector<8x40xf32>
    %10 = tpu.matmul %0, %9, %cst_9 {dimension_numbers = #tpu.dot_dimension_numbers<[1], [0], [0], [1], [0, 0, 1, 1], [], []>} : vector<8x320xbf16>, vector<320x40xbf16>, vector<8x40xf32> -> vector<8x40xf32>
    %11 = arith.maximumf %7, %10 : vector<8x40xf32>
    %c3 = arith.constant 3 : index
    %c0_10 = arith.constant 0 : index
    %c0_11 = arith.constant 0 : index
    %12 = vector.load %arg2[%c3, %c0_10, %c0_11] : memref<4x320x40xbf16, #tpu.memory_space<vmem>>, vector<1x320x40xbf16>
    %13 = vector.shape_cast %12 : vector<1x320x40xbf16> to vector<320x40xbf16>
    %cst_12 = arith.constant dense<0.000000e+00> : vector<8x40xf32>
    %14 = tpu.matmul %0, %13, %cst_12 {dimension_numbers = #tpu.dot_dimension_numbers<[1], [0], [0], [1], [0, 0, 1, 1], [], []>} : vector<8x320xbf16>, vector<320x40xbf16>, vector<8x40xf32> -> vector<8x40xf32>
    %15 = arith.maximumf %11, %14 : vector<8x40xf32>
    %c0_13 = arith.constant 0 : index
    %c0_14 = arith.constant 0 : index
    %16 = vector.load %arg3[%c0_13, %c0_14] : memref<1x40xf32, #tpu.memory_space<vmem>>, vector<1x40xf32>
    %17 = vector.broadcast %16 : vector<1x40xf32> to vector<8x40xf32>
    %18 = arith.addf %15, %17 : vector<8x40xf32>
    %cst_15 = arith.constant 0.000000e+00 : f32
    %19 = vector.broadcast %cst_15 : f32 to vector<8x40xf32>
    %20 = arith.maximumf %18, %19 : vector<8x40xf32>
    %21 = arith.truncf %20 : vector<8x40xf32> to vector<8x40xbf16>
    %c0_16 = arith.constant 0 : index
    %c0_17 = arith.constant 0 : index
    %22 = vector.load %arg4[%c0_16, %c0_17] : memref<40x80xbf16, #tpu.memory_space<vmem>>, vector<40x80xbf16>
    %cst_18 = arith.constant dense<0.000000e+00> : vector<8x80xf32>
    %23 = tpu.matmul %21, %22, %cst_18 {dimension_numbers = #tpu.dot_dimension_numbers<[1], [0], [0], [1], [0, 0, 1, 1], [], []>} : vector<8x40xbf16>, vector<40x80xbf16>, vector<8x80xf32> -> vector<8x80xf32>
    %c0_19 = arith.constant 0 : index
    %c0_20 = arith.constant 0 : index
    %24 = vector.load %arg5[%c0_19, %c0_20] : memref<1x80xf32, #tpu.memory_space<vmem>>, vector<1x80xf32>
    %25 = vector.broadcast %24 : vector<1x80xf32> to vector<8x80xf32>
    %26 = arith.addf %23, %25 : vector<8x80xf32>
    %cst_21 = arith.constant 0.000000e+00 : f32
    %27 = vector.broadcast %cst_21 : f32 to vector<8x80xf32>
    %28 = arith.maximumf %26, %27 : vector<8x80xf32>
    %29 = arith.truncf %28 : vector<8x80xf32> to vector<8x80xbf16>
    %c0_22 = arith.constant 0 : index
    %c0_23 = arith.constant 0 : index
    %30 = vector.load %arg6[%c0_22, %c0_23] : memref<80x50xbf16, #tpu.memory_space<vmem>>, vector<80x50xbf16>
    %cst_24 = arith.constant dense<0.000000e+00> : vector<8x50xf32>
    %31 = tpu.matmul %29, %30, %cst_24 {dimension_numbers = #tpu.dot_dimension_numbers<[1], [0], [0], [1], [0, 0, 1, 1], [], []>} : vector<8x80xbf16>, vector<80x50xbf16>, vector<8x50xf32> -> vector<8x50xf32>
    %c0_25 = arith.constant 0 : index
    %c0_26 = arith.constant 0 : index
    %32 = vector.load %arg7[%c0_25, %c0_26] : memref<1x50xf32, #tpu.memory_space<vmem>>, vector<1x50xf32>
    %33 = vector.broadcast %32 : vector<1x50xf32> to vector<8x50xf32>
    %34 = arith.addf %31, %33 : vector<8x50xf32>
    %cst_27 = arith.constant 0.000000e+00 : f32
    %35 = vector.broadcast %cst_27 : f32 to vector<8x50xf32>
    %36 = arith.maximumf %34, %35 : vector<8x50xf32>
    %37 = arith.truncf %36 : vector<8x50xf32> to vector<8x50xbf16>
    %c0_28 = arith.constant 0 : index
    %c0_29 = arith.constant 0 : index
    %38 = vector.load %arg8[%c0_28, %c0_29] : memref<50x10xbf16, #tpu.memory_space<vmem>>, vector<50x10xbf16>
    %cst_30 = arith.constant dense<0.000000e+00> : vector<8x10xf32>
    %39 = tpu.matmul %37, %38, %cst_30 {dimension_numbers = #tpu.dot_dimension_numbers<[1], [0], [0], [1], [0, 0, 1, 1], [], []>} : vector<8x50xbf16>, vector<50x10xbf16>, vector<8x10xf32> -> vector<8x10xf32>
    %c0_31 = arith.constant 0 : index
    %c0_32 = arith.constant 0 : index
    %40 = vector.load %arg9[%c0_31, %c0_32] : memref<1x10xf32, #tpu.memory_space<vmem>>, vector<1x10xf32>
    %41 = vector.broadcast %40 : vector<1x10xf32> to vector<8x10xf32>
    %42 = arith.addf %39, %41 : vector<8x10xf32>
    %cst_33 = arith.constant dense<0xFF800000> : vector<8xf32>
    %43 = vector.multi_reduction <maximumf>, %42, %cst_33 [1] : vector<8x10xf32> to vector<8xf32>
    %44 = vector.shape_cast %43 : vector<8xf32> to vector<8x1xf32>
    %45 = vector.broadcast %44 : vector<8x1xf32> to vector<8x10xf32>
    %46 = arith.subf %42, %45 : vector<8x10xf32>
    %47 = math.exp %46 : vector<8x10xf32>
    %cst_34 = arith.constant dense<0.000000e+00> : vector<8xf32>
    %48 = vector.multi_reduction <add>, %47, %cst_34 [1] : vector<8x10xf32> to vector<8xf32>
    %49 = vector.shape_cast %48 : vector<8xf32> to vector<8x1xf32>
    %50 = math.log %49 : vector<8x1xf32>
    %51 = vector.broadcast %50 : vector<8x1xf32> to vector<8x10xf32>
    %52 = arith.subf %46, %51 : vector<8x10xf32>
    %c0_35 = arith.constant 0 : index
    %c0_36 = arith.constant 0 : index
    %53 = vector.load %arg10[%c0_35, %c0_36] : memref<8x10xf32, #tpu.memory_space<vmem>>, vector<8x10xf32>
    tpu.vector_store %arg10[%c0_35, %c0_36], %52 {strides = array<i32>} : memref<8x10xf32, #tpu.memory_space<vmem>>, vector<8x10xf32>,
    return
  }
  func.func @transform_0(%arg0: i32) -> (i32, i32) {
    %c0_i32 = arith.constant 0 : i32
    %c0_i32_0 = arith.constant 0 : i32
    return %arg0, %c0_i32 : i32, i32
  }
  func.func @transform_1(%arg0: i32) -> (i32, i32, i32) {
    %c0_i32 = arith.constant 0 : i32
    %c0_i32_0 = arith.constant 0 : i32
    %c0_i32_1 = arith.constant 0 : i32
    %c0_i32_2 = arith.constant 0 : i32
    return %c0_i32, %c0_i32_0, %c0_i32_1 : i32, i32, i32
  }
  func.func @transform_2(%arg0: i32) -> (i32, i32) {
    %c0_i32 = arith.constant 0 : i32
    %c0_i32_0 = arith.constant 0 : i32
    %c0_i32_1 = arith.constant 0 : i32
    return %c0_i32, %c0_i32_0 : i32, i32
  }
  func.func @transform_3(%arg0: i32) -> (i32, i32) {
    %c0_i32 = arith.constant 0 : i32
    %c0_i32_0 = arith.constant 0 : i32
    %c0_i32_1 = arith.constant 0 : i32
    return %c0_i32, %c0_i32_0 : i32, i32
  }
  func.func @transform_4(%arg0: i32) -> (i32, i32) {
    %c0_i32 = arith.constant 0 : i32
    %c0_i32_0 = arith.constant 0 : i32
    %c0_i32_1 = arith.constant 0 : i32
    return %c0_i32, %c0_i32_0 : i32, i32
  }
  func.func @transform_5(%arg0: i32) -> (i32, i32) {
    %c0_i32 = arith.constant 0 : i32
    %c0_i32_0 = arith.constant 0 : i32
    %c0_i32_1 = arith.constant 0 : i32
    return %c0_i32, %c0_i32_0 : i32, i32
  }
  func.func @transform_6(%arg0: i32) -> (i32, i32) {
    %c0_i32 = arith.constant 0 : i32
    %c0_i32_0 = arith.constant 0 : i32
    %c0_i32_1 = arith.constant 0 : i32
    return %c0_i32, %c0_i32_0 : i32, i32
  }
  func.func @transform_7(%arg0: i32) -> (i32, i32) {
    %c0_i32 = arith.constant 0 : i32
    %c0_i32_0 = arith.constant 0 : i32
    %c0_i32_1 = arith.constant 0 : i32
    return %c0_i32, %c0_i32_0 : i32, i32
  }
  func.func @transform_8(%arg0: i32) -> (i32, i32) {
    %c0_i32 = arith.constant 0 : i32
    %c0_i32_0 = arith.constant 0 : i32
    %c0_i32_1 = arith.constant 0 : i32
    return %c0_i32, %c0_i32_0 : i32, i32
  }
  func.func @transform_9(%arg0: i32) -> (i32, i32) {
    %c0_i32 = arith.constant 0 : i32
    %c0_i32_0 = arith.constant 0 : i32
    return %arg0, %c0_i32 : i32, i32
  }
}

</mosaic_0001>

<bundles_post_ra>
// kernel: cnn_forward.3
= control target key start
LH: loop header
LB: loop body
LE: loop exit
PB: predicated region body
PF: predicated region fallthrough
CT: control target
= control target key end

     0   :  { %s947_s12 = smov 0   ;;  %s1115_s0 = inlined_call_operand.vmem [shape: bf16[288,36], index: 0, kind: input, shape index: {}]   ;;  %s1116_s1 = inlined_call_operand.vmem [shape: bf16[4,36,10], index: 1, kind: input, shape index: {}]   ;;  %s1117_s2 = inlined_call_operand.vmem [shape: f32[1,10], index: 2, kind: input, shape index: {}]   ;;  %s1118_s3 = inlined_call_operand.vmem [shape: bf16[288,10], index: 3, kind: output, shape index: {}]  }
   0x1 LB: > { %s765_s13 = sadd.s32 4294967295, %s925_s12   ;;  %p769_p0 = scmp.ge.s32.totalorder %s925_s12, 1  ;;  %s925_s12 = sphi %s947_s12, %s13_s12  }
   0x2   : > { %p138_p1 = scmp.lt.s32.totalorder %s925_s12, 3 }
   0x4   : > { %p139_p2 = pnand %p769_p0, %p138_p1 }
   0x5   : > { %s162_s22 = smul.u32 (!%p139_p2), 18, %s765_s13 }
   0x6   : > { %142 = sbr.rel (%p139_p2) target bundleno = 308 (0x134), region = 32 }
   0x7   : > { %p163_p3 = scmp.lt.s32.totalorder (!%p139_p2), %s162_s22, 35 }
   0xb   : > { %v197_v0 = vld [vmem:[%s1116_s1 + $0x10] sm:$0x3]  ;;  %v829_v1 = vld [vmem:[%s1116_s1 + $0x24] sm:$0x3]  ;;  %v851_v4 = vld [vmem:[%s1116_s1 + $0x38] sm:$0x3] }
   0xc   : > { %v252_v2 = vunpack.c.l.b16 %v197_v0  ;;  %v359_v3 = vunpack.c.l.b16 %v829_v1  ;;  %v873_v5 = vld [vmem:[%s1116_s1 + $0x4c] sm:$0x3]  ;;  %vm286_vm0 = vcmask 1041408   ;;  %v455_v6 = vunpack.c.l.b16 %v851_v4  ;;  %s1120_s22 = smov (!%p163_p3, %s162_s22), 35  ;;  %v905_v17 = vld [vmem:[%s1116_s1 + $0x1c] sm:$0xff]  ;;  %v907_v18 = vld [vmem:[%s1116_s1 + $0x30] sm:$0xff] }
   0xd   : > { %v551_v7 = vunpack.c.l.b16 %v873_v5  ;;  %v903_v16 = vld [vmem:[%s1116_s1 + $0x8] sm:$0xff]  ;;  %s770_s4 = sshll.u32 %s1120_s22, 2  ;;  %v902_v20 = vld [vmem:[%s1116_s1] sm:$0xff]  ;;  %v904_v21 = vld [vmem:[%s1116_s1 + $0x14] sm:$0xff]  ;;  %vm258_vm1 = vcmask 293888   ;;  %vm690_vm2 = vcmask 76800  }
   0xe   : > { %v255_v8 = vpack.c.b16 %v252_v2, %v252_v2  ;;  %v362_v9 = vpack.c.b16 %v359_v3, %v359_v3  ;;  %v458_v10 = vpack.c.b16 %v455_v6, %v455_v6  ;;  %v909_v19 = vld [vmem:[%s1116_s1 + $0x44] sm:$0xff]  ;;  %s993_s11 = scalar_lea.vmem %s1115_s0, %s770_s4  ;;  %v908_v23 = vld [vmem:[%s1116_s1 + $0x3c] sm:$0xff]  ;;  %s1057_s21 = scalar_lea.vmem %s1118_s3, %s770_s4 }
   0xf   : > { %v554_v11 = vpack.c.b16 %v551_v7, %v551_v7  ;;  %v906_v22 = vld [vmem:[%s1116_s1 + $0x28] sm:$0xff]  ;;  %v893_v24 = vld [vmem:[%s993_s11] sm:$0xff]  ;;  %v895_v26 = vld [vmem:[%s993_s11 + $0x10] sm:$0xff] }
  0x10   : > { %v288_v12 = vsel %vm286_vm0, %v255_v8, 0  ;;  %v366_v13 = vsel %vm286_vm0, %v362_v9, 0  ;;  %v462_v14 = vsel %vm286_vm0, %v458_v10, 0  ;;  %v894_v25 = vld [vmem:[%s993_s11 + $0x8] sm:$0xff]  ;;  %v896_v27 = vld [vmem:[%s993_s11 + $0x18] sm:$0xff]  ;;  %v897_v28 = vld [vmem:[%s993_s11 + $0x20] sm:$0xff] }
  0x11   : > { %295 = vmatpush.bf16.msra.mxu0 %v288_v12  ;;  %373 = vmatpush.bf16.msra.mxu1 %v366_v13  ;;  %v558_v15 = vsel %vm286_vm0, %v554_v11, 0  ;;  %v898_v29 = vld [vmem:[%s993_s11 + $0x28] sm:$0xff]  ;;  %v899_v30 = vld [vmem:[%s993_s11 + $0x30] sm:$0xff]  ;;  %v900_v31 = vld [vmem:[%s993_s11 + $0x38] sm:$0xff] }
  0x12   : > { %469 = vmatpush.bf16.msra.mxu2 %v462_v14  ;;  %565 = vmatpush.bf16.msra.mxu3 %v558_v15  ;;  %v901_v32 = vld [vmem:[%s993_s11 + $0x40] sm:$0xff] }
  0x13   : > { %v1049_v39 = vld [vmem:[%s1117_s2] ss:$0 sm:$0xff] }
  0x15   : > { %296 = vmatpush.bf16.msra.mxu0 %v903_v16  ;;  %374 = vmatpush.bf16.msra.mxu1 %v905_v17 }
  0x16   : > { %470 = vmatpush.bf16.msra.mxu2 %v907_v18  ;;  %566 = vmatpush.bf16.msra.mxu3 %v909_v19 }
  0x19   : > { %297 = vmatpush.bf16.msra.mxu0 %v902_v20  ;;  %375 = vmatpush.bf16.msra.mxu1 %v904_v21 }
  0x1a   : > { %471 = vmatpush.bf16.msra.mxu2 %v906_v22  ;;  %567 = vmatpush.bf16.msra.mxu3 %v908_v23 }
  0x1c   : > { %816 = vmatmul.msk.bf16.vlgmr.msra.gmra.mxu0 %vm258_vm1, %v893_v24  ;;  %838 = vmatmul.msk.bf16.vlgmr.msra.gmra.mxu1 %vm258_vm1, %v893_v24 }
  0x1d   : > { %860 = vmatmul.msk.bf16.vlgmr.msra.gmra.mxu2 %vm258_vm1, %v893_v24  ;;  %882 = vmatmul.msk.bf16.vlgmr.msra.gmra.mxu3 %vm258_vm1, %v893_v24 }
  0x2c   : > { %817 = vmatmul.msk.bf16.gmra.mxu0 %vm258_vm1, %v894_v25  ;;  %839 = vmatmul.msk.bf16.gmra.mxu1 %vm258_vm1, %v894_v25 }
  0x2d   : > { %861 = vmatmul.msk.bf16.gmra.mxu2 %vm258_vm1, %v894_v25  ;;  %883 = vmatmul.msk.bf16.gmra.mxu3 %vm258_vm1, %v894_v25 }
  0x3c   : > { %818 = vmatmul.msk.bf16.gmra.mxu0 %vm258_vm1, %v895_v26  ;;  %840 = vmatmul.msk.bf16.gmra.mxu1 %vm258_vm1, %v895_v26 }
  0x3d   : > { %862 = vmatmul.msk.bf16.gmra.mxu2 %vm258_vm1, %v895_v26  ;;  %884 = vmatmul.msk.bf16.gmra.mxu3 %vm258_vm1, %v895_v26 }
  0x4c   : > { %819 = vmatmul.msk.bf16.gmra.mxu0 %vm258_vm1, %v896_v27  ;;  %841 = vmatmul.msk.bf16.gmra.mxu1 %vm258_vm1, %v896_v27 }
  0x4d   : > { %863 = vmatmul.msk.bf16.gmra.mxu2 %vm258_vm1, %v896_v27  ;;  %885 = vmatmul.msk.bf16.gmra.mxu3 %vm258_vm1, %v896_v27 }
  0x5c   : > { %820 = vmatmul.msk.bf16.gmra.mxu0 %vm258_vm1, %v897_v28  ;;  %842 = vmatmul.msk.bf16.gmra.mxu1 %vm258_vm1, %v897_v28 }
  0x5d   : > { %864 = vmatmul.msk.bf16.gmra.mxu2 %vm258_vm1, %v897_v28  ;;  %886 = vmatmul.msk.bf16.gmra.mxu3 %vm258_vm1, %v897_v28 }
  0x6c   : > { %821 = vmatmul.msk.bf16.gmra.mxu0 %vm258_vm1, %v898_v29  ;;  %843 = vmatmul.msk.bf16.gmra.mxu1 %vm258_vm1, %v898_v29 }
  0x6d   : > { %865 = vmatmul.msk.bf16.gmra.mxu2 %vm258_vm1, %v898_v29  ;;  %887 = vmatmul.msk.bf16.gmra.mxu3 %vm258_vm1, %v898_v29 }
  0x7c   : > { %822 = vmatmul.msk.bf16.gmra.mxu0 %vm258_vm1, %v899_v30  ;;  %844 = vmatmul.msk.bf16.gmra.mxu1 %vm258_vm1, %v899_v30 }
  0x7d   : > { %866 = vmatmul.msk.bf16.gmra.mxu2 %vm258_vm1, %v899_v30  ;;  %888 = vmatmul.msk.bf16.gmra.mxu3 %vm258_vm1, %v899_v30 }
  0x8c   : > { %823 = vmatmul.msk.bf16.gmra.mxu0 %vm258_vm1, %v900_v31  ;;  %845 = vmatmul.msk.bf16.gmra.mxu1 %vm258_vm1, %v900_v31 }
  0x8d   : > { %867 = vmatmul.msk.bf16.gmra.mxu2 %vm258_vm1, %v900_v31  ;;  %889 = vmatmul.msk.bf16.gmra.mxu3 %vm258_vm1, %v900_v31 }
  0x99   : > { %v299_v33 = vpop.f32.mrf.mxu0  ;;  %v377_v34 = vpop.f32.mrf.mxu1 }
  0x9a   : > { %v422_v35 = vmax.f32 %v299_v33, %v377_v34 }
  0x9c   : > { %824 = vmatmul.msk.bf16.gmra.mxu0 %vm258_vm1, %v901_v32  ;;  %846 = vmatmul.msk.bf16.gmra.mxu1 %vm258_vm1, %v901_v32 }
  0x9d   : > { %868 = vmatmul.msk.bf16.gmra.mxu2 %vm258_vm1, %v901_v32  ;;  %890 = vmatmul.msk.bf16.gmra.mxu3 %vm258_vm1, %v901_v32 }
  0xa0   : > { %v473_v36 = vpop.f32.mrf.mxu2  ;;  %v569_v37 = vpop.f32.mrf.mxu3 }
  0xa1   : > { %v518_v38 = vmax.f32 %v422_v35, %v473_v36  ;;  %v301_v40 = vpop.f32.mrf.mxu0  ;;  %v379_v41 = vpop.f32.mrf.mxu1 }
  0xa2   : > { %v423_v45 = vmax.f32 %v301_v40, %v379_v41 }
  0xa3   : > { %v614_v42 = vmax.f32 %v518_v38, %v569_v37 }
  0xa5   : > { %v636_v43 = vadd.f32 %v1049_v39, %v614_v42 }
  0xa7   : > { %v654_v44 = vmax.f32 %v636_v43, 0.0 }
  0xa8   : > { %v475_v46 = vpop.f32.mrf.mxu2  ;;  %v571_v47 = vpop.f32.mrf.mxu3 }
  0xa9   : > { %v672_v48 = vpack.c.bf16 %v654_v44, %v654_v44  ;;  %v519_v49 = vmax.f32 %v423_v45, %v475_v46  ;;  %v304_v50 = vpop.f32.mrf.mxu0  ;;  %v382_v51 = vpop.f32.mrf.mxu1 }
  0xaa   : > { %v424_v54 = vmax.f32 %v304_v50, %v382_v51 }
  0xab   : > { %691 = vst.msk [vmem:[%s1057_s21] sm:$0xf] %vm690_vm2, %v672_v48  ;;  %v615_v52 = vmax.f32 %v519_v49, %v571_v47 }
  0xad   : > { %v637_v53 = vadd.f32 %v1049_v39, %v615_v52 }
  0xaf   : > { %v655_v55 = vmax.f32 %v637_v53, 0.0 }
  0xb0   : > { %v478_v56 = vpop.f32.mrf.mxu2  ;;  %v574_v57 = vpop.f32.mrf.mxu3 }
  0xb1   : > { %v673_v58 = vpack.c.bf16 %v655_v55, %v655_v55  ;;  %v520_v59 = vmax.f32 %v424_v54, %v478_v56  ;;  %v306_v60 = vpop.f32.mrf.mxu0  ;;  %v384_v61 = vpop.f32.mrf.mxu1 }
  0xb2   : > { %v425_v1 = vmax.f32 %v306_v60, %v384_v61 }
  0xb3   : > { %692 = vst.msk [vmem:[%s1057_s21 + $0x4] sm:$0xf] %vm690_vm2, %v673_v58  ;;  %v616_v62 = vmax.f32 %v520_v59, %v574_v57 }
  0xb5   : > { %v638_v63 = vadd.f32 %v1049_v39, %v616_v62 }
  0xb7   : > { %v656_v0 = vmax.f32 %v638_v63, 0.0 }
  0xb8   : > { %v480_v2 = vpop.f32.mrf.mxu2  ;;  %v576_v3 = vpop.f32.mrf.mxu3 }
  0xb9   : > { %v674_v4 = vpack.c.bf16 %v656_v0, %v656_v0  ;;  %v521_v5 = vmax.f32 %v425_v1, %v480_v2  ;;  %v309_v6 = vpop.f32.mrf.mxu0  ;;  %v387_v7 = vpop.f32.mrf.mxu1 }
  0xba   : > { %v426_v10 = vmax.f32 %v309_v6, %v387_v7 }
  0xbb   : > { %693 = vst.msk [vmem:[%s1057_s21 + $0x8] sm:$0xf] %vm690_vm2, %v674_v4  ;;  %v617_v8 = vmax.f32 %v521_v5, %v576_v3 }
  0xbd   : > { %v639_v9 = vadd.f32 %v1049_v39, %v617_v8 }
  0xbf   : > { %v657_v11 = vmax.f32 %v639_v9, 0.0 }
  0xc0   : > { %v483_v12 = vpop.f32.mrf.mxu2  ;;  %v579_v13 = vpop.f32.mrf.mxu3 }
  0xc1   : > { %v675_v14 = vpack.c.bf16 %v657_v11, %v657_v11  ;;  %v522_v15 = vmax.f32 %v426_v10, %v483_v12  ;;  %v311_v16 = vpop.f32.mrf.mxu0  ;;  %v389_v17 = vpop.f32.mrf.mxu1 }
  0xc2   : > { %v427_v21 = vmax.f32 %v311_v16, %v389_v17 }
  0xc3   : > { %694 = vst.msk [vmem:[%s1057_s21 + $0xc] sm:$0xf] %vm690_vm2, %v675_v14  ;;  %v618_v18 = vmax.f32 %v522_v15, %v579_v13 }
  0xc5   : > { %v640_v19 = vadd.f32 %v1049_v39, %v618_v18 }
  0xc7   : > { %v658_v20 = vmax.f32 %v640_v19, 0.0 }
  0xc8   : > { %v485_v22 = vpop.f32.mrf.mxu2  ;;  %v581_v23 = vpop.f32.mrf.mxu3 }
  0xc9   : > { %v676_v24 = vpack.c.bf16 %v658_v20, %v658_v20  ;;  %v523_v25 = vmax.f32 %v427_v21, %v485_v22  ;;  %v314_v26 = vpop.f32.mrf.mxu0  ;;  %v392_v27 = vpop.f32.mrf.mxu1 }
  0xca   : > { %v428_v30 = vmax.f32 %v314_v26, %v392_v27 }
  0xcb   : > { %695 = vst.msk [vmem:[%s1057_s21 + $0x10] sm:$0xf] %vm690_vm2, %v676_v24  ;;  %v619_v28 = vmax.f32 %v523_v25, %v581_v23 }
  0xcd   : > { %v641_v29 = vadd.f32 %v1049_v39, %v619_v28 }
  0xcf   : > { %v659_v31 = vmax.f32 %v641_v29, 0.0 }
  0xd0   : > { %v488_v32 = vpop.f32.mrf.mxu2  ;;  %v584_v33 = vpop.f32.mrf.mxu3 }
  0xd1   : > { %v677_v34 = vpack.c.bf16 %v659_v31, %v659_v31  ;;  %v524_v35 = vmax.f32 %v428_v30, %v488_v32  ;;  %v316_v36 = vpop.f32.mrf.mxu0  ;;  %v394_v37 = vpop.f32.mrf.mxu1 }
  0xd2   : > { %v429_v42 = vmax.f32 %v316_v36, %v394_v37 }
  0xd3   : > { %696 = vst.msk [vmem:[%s1057_s21 + $0x14] sm:$0xf] %vm690_vm2, %v677_v34  ;;  %v620_v38 = vmax.f32 %v524_v35, %v584_v33 }
  0xd5   : > { %v642_v40 = vadd.f32 %v1049_v39, %v620_v38 }
  0xd7   : > { %v660_v41 = vmax.f32 %v642_v40, 0.0 }
  0xd8   : > { %v490_v43 = vpop.f32.mrf.mxu2  ;;  %v586_v44 = vpop.f32.mrf.mxu3 }
  0xd9   : > { %v678_v45 = vpack.c.bf16 %v660_v41, %v660_v41  ;;  %v525_v46 = vmax.f32 %v429_v42, %v490_v43  ;;  %v319_v47 = vpop.f32.mrf.mxu0  ;;  %v397_v48 = vpop.f32.mrf.mxu1 }
  0xda   : > { %v430_v51 = vmax.f32 %v319_v47, %v397_v48 }
  0xdb   : > { %697 = vst.msk [vmem:[%s1057_s21 + $0x18] sm:$0xf] %vm690_vm2, %v678_v45  ;;  %v621_v49 = vmax.f32 %v525_v46, %v586_v44 }
  0xdd   : > { %v643_v50 = vadd.f32 %v1049_v39, %v621_v49 }
  0xdf   : > { %v661_v52 = vmax.f32 %v643_v50, 0.0 }
  0xe0   : > { %v493_v53 = vpop.f32.mrf.mxu2  ;;  %v589_v54 = vpop.f32.mrf.mxu3 }
  0xe1   : > { %v679_v55 = vpack.c.bf16 %v661_v52, %v661_v52  ;;  %v526_v56 = vmax.f32 %v430_v51, %v493_v53  ;;  %v321_v57 = vpop.f32.mrf.mxu0  ;;  %v399_v58 = vpop.f32.mrf.mxu1 }
  0xe2   : > { %v431_v62 = vmax.f32 %v321_v57, %v399_v58 }
  0xe3   : > { %698 = vst.msk [vmem:[%s1057_s21 + $0x1c] sm:$0xf] %vm690_vm2, %v679_v55  ;;  %v622_v59 = vmax.f32 %v526_v56, %v589_v54 }
  0xe5   : > { %v644_v60 = vadd.f32 %v1049_v39, %v622_v59 }
  0xe7   : > { %v662_v61 = vmax.f32 %v644_v60, 0.0 }
  0xe8   : > { %v495_v63 = vpop.f32.mrf.mxu2  ;;  %v591_v0 = vpop.f32.mrf.mxu3 }
  0xe9   : > { %v680_v1 = vpack.c.bf16 %v662_v61, %v662_v61  ;;  %v527_v2 = vmax.f32 %v431_v62, %v495_v63  ;;  %v324_v3 = vpop.f32.mrf.mxu0  ;;  %v402_v4 = vpop.f32.mrf.mxu1 }
  0xea   : > { %v432_v7 = vmax.f32 %v324_v3, %v402_v4 }
  0xeb   : > { %699 = vst.msk [vmem:[%s1057_s21 + $0x20] sm:$0xf] %vm690_vm2, %v680_v1  ;;  %v623_v5 = vmax.f32 %v527_v2, %v591_v0 }
  0xed   : > { %v645_v6 = vadd.f32 %v1049_v39, %v623_v5 }
  0xef   : > { %v663_v8 = vmax.f32 %v645_v6, 0.0 }
  0xf0   : > { %v498_v9 = vpop.f32.mrf.mxu2  ;;  %v594_v10 = vpop.f32.mrf.mxu3 }
  0xf1   : > { %v681_v11 = vpack.c.bf16 %v663_v8, %v663_v8  ;;  %v528_v12 = vmax.f32 %v432_v7, %v498_v9  ;;  %v326_v13 = vpop.f32.mrf.mxu0  ;;  %v404_v14 = vpop.f32.mrf.mxu1 }
  0xf2   : > { %v433_v18 = vmax.f32 %v326_v13, %v404_v14 }
  0xf3   : > { %700 = vst.msk [vmem:[%s1057_s21 + $0x24] sm:$0xf] %vm690_vm2, %v681_v11  ;;  %v624_v15 = vmax.f32 %v528_v12, %v594_v10 }
  0xf5   : > { %v646_v16 = vadd.f32 %v1049_v39, %v624_v15 }
  0xf7   : > { %v664_v17 = vmax.f32 %v646_v16, 0.0 }
  0xf8   : > { %v500_v19 = vpop.f32.mrf.mxu2  ;;  %v596_v20 = vpop.f32.mrf.mxu3 }
  0xf9   : > { %v682_v21 = vpack.c.bf16 %v664_v17, %v664_v17  ;;  %v529_v22 = vmax.f32 %v433_v18, %v500_v19  ;;  %v329_v23 = vpop.f32.mrf.mxu0  ;;  %v407_v24 = vpop.f32.mrf.mxu1 }
  0xfa   : > { %v434_v27 = vmax.f32 %v329_v23, %v407_v24 }
  0xfb   : > { %701 = vst.msk [vmem:[%s1057_s21 + $0x28] sm:$0xf] %vm690_vm2, %v682_v21  ;;  %v625_v25 = vmax.f32 %v529_v22, %v596_v20 }
  0xfd   : > { %v647_v26 = vadd.f32 %v1049_v39, %v625_v25 }
  0xff   : > { %v665_v28 = vmax.f32 %v647_v26, 0.0 }
 0x100   : > { %v503_v29 = vpop.f32.mrf.mxu2  ;;  %v599_v30 = vpop.f32.mrf.mxu3 }
 0x101   : > { %v683_v31 = vpack.c.bf16 %v665_v28, %v665_v28  ;;  %v530_v32 = vmax.f32 %v434_v27, %v503_v29  ;;  %v331_v33 = vpop.f32.mrf.mxu0  ;;  %v409_v34 = vpop.f32.mrf.mxu1 }
 0x102   : > { %v435_v38 = vmax.f32 %v331_v33, %v409_v34 }
 0x103   : > { %702 = vst.msk [vmem:[%s1057_s21 + $0x2c] sm:$0xf] %vm690_vm2, %v683_v31  ;;  %v626_v35 = vmax.f32 %v530_v32, %v599_v30 }
 0x105   : > { %v648_v36 = vadd.f32 %v1049_v39, %v626_v35 }
 0x107   : > { %v666_v37 = vmax.f32 %v648_v36, 0.0 }
 0x108   : > { %v505_v40 = vpop.f32.mrf.mxu2  ;;  %v601_v41 = vpop.f32.mrf.mxu3 }
 0x109   : > { %v684_v42 = vpack.c.bf16 %v666_v37, %v666_v37  ;;  %v531_v43 = vmax.f32 %v435_v38, %v505_v40  ;;  %v334_v44 = vpop.f32.mrf.mxu0  ;;  %v412_v45 = vpop.f32.mrf.mxu1 }
 0x10a   : > { %v436_v48 = vmax.f32 %v334_v44, %v412_v45 }
 0x10b   : > { %703 = vst.msk [vmem:[%s1057_s21 + $0x30] sm:$0xf] %vm690_vm2, %v684_v42  ;;  %v627_v46 = vmax.f32 %v531_v43, %v601_v41 }
 0x10d   : > { %v649_v47 = vadd.f32 %v1049_v39, %v627_v46 }
 0x10f   : > { %v667_v49 = vmax.f32 %v649_v47, 0.0 }
 0x110   : > { %v508_v50 = vpop.f32.mrf.mxu2  ;;  %v604_v51 = vpop.f32.mrf.mxu3 }
 0x111   : > { %v685_v52 = vpack.c.bf16 %v667_v49, %v667_v49  ;;  %v532_v53 = vmax.f32 %v436_v48, %v508_v50  ;;  %v336_v54 = vpop.f32.mrf.mxu0  ;;  %v414_v55 = vpop.f32.mrf.mxu1 }
 0x112   : > { %v437_v59 = vmax.f32 %v336_v54, %v414_v55 }
 0x113   : > { %704 = vst.msk [vmem:[%s1057_s21 + $0x34] sm:$0xf] %vm690_vm2, %v685_v52  ;;  %v628_v56 = vmax.f32 %v532_v53, %v604_v51 }
 0x115   : > { %v650_v57 = vadd.f32 %v1049_v39, %v628_v56 }
 0x117   : > { %v668_v58 = vmax.f32 %v650_v57, 0.0 }
 0x118   : > { %v510_v60 = vpop.f32.mrf.mxu2  ;;  %v606_v61 = vpop.f32.mrf.mxu3 }
 0x119   : > { %v686_v62 = vpack.c.bf16 %v668_v58, %v668_v58  ;;  %v533_v63 = vmax.f32 %v437_v59, %v510_v60  ;;  %v339_v0 = vpop.f32.mrf.mxu0  ;;  %v417_v1 = vpop.f32.mrf.mxu1 }
 0x11a   : > { %v438_v4 = vmax.f32 %v339_v0, %v417_v1 }
 0x11b   : > { %705 = vst.msk [vmem:[%s1057_s21 + $0x38] sm:$0xf] %vm690_vm2, %v686_v62  ;;  %v629_v2 = vmax.f32 %v533_v63, %v606_v61 }
 0x11d   : > { %v651_v3 = vadd.f32 %v1049_v39, %v629_v2 }
 0x11f   : > { %v669_v5 = vmax.f32 %v651_v3, 0.0 }
 0x120   : > { %v513_v6 = vpop.f32.mrf.mxu2  ;;  %v609_v7 = vpop.f32.mrf.mxu3 }
 0x121   : > { %v687_v8 = vpack.c.bf16 %v669_v5, %v669_v5  ;;  %v534_v9 = vmax.f32 %v438_v4, %v513_v6  ;;  %v341_v11 = vpop.f32.mrf.mxu0  ;;  %v419_v12 = vpop.f32.mrf.mxu1 }
 0x122   : > { %v439_v15 = vmax.f32 %v341_v11, %v419_v12 }
 0x123   : > { %706 = vst.msk [vmem:[%s1057_s21 + $0x3c] sm:$0xf] %vm690_vm2, %v687_v8  ;;  %v630_v10 = vmax.f32 %v534_v9, %v609_v7 }
 0x125   : > { %v652_v13 = vadd.f32 %v1049_v39, %v630_v10 }
 0x127   : > { %v670_v14 = vmax.f32 %v652_v13, 0.0 }
 0x128   : > { %v515_v16 = vpop.f32.mrf.mxu2  ;;  %v611_v19 = vpop.f32.mrf.mxu3 }
 0x129   : > { %v688_v17 = vpack.c.bf16 %v670_v14, %v670_v14  ;;  %v535_v18 = vmax.f32 %v439_v15, %v515_v16 }
 0x12b   : > { %707 = vst.msk [vmem:[%s1057_s21 + $0x40] sm:$0xf] %vm690_vm2, %v688_v17  ;;  %v631_v20 = vmax.f32 %v535_v18, %v611_v19 }
 0x12d   : > { %v653_v21 = vadd.f32 %v1049_v39, %v631_v20 }
 0x12f   : > { %v671_v22 = vmax.f32 %v653_v21, 0.0 }
 0x131   : > { %v689_v23 = vpack.c.bf16 %v671_v22, %v671_v22 }
 0x133   : > { %708 = vst.msk [vmem:[%s1057_s21 + $0x44] sm:$0xf] %vm690_vm2, %v689_v23 }
 0x134 PF: > { %s13_s12 = sadd.s32 1, %s925_s12  }
 0x135   : > { %p10_p4 = scmp.ge.s32.totalorder %s13_s12, 4  }
 0x137   :  { %12 = sbr.rel (!%p10_p4) target bundleno = 1 (0x1), region = 65 }

// kernel: cnn_forward.4
= control target key start
LH: loop header
LB: loop body
LE: loop exit
PB: predicated region body
PF: predicated region fallthrough
CT: control target
= control target key end

     0   :  { %s1823_s12 = smov 0   ;;  %s2149_s0 = inlined_call_operand.vmem [shape: bf16[32,360], index: 0, kind: input, shape index: {}]   ;;  %s2150_s1 = inlined_call_operand.vmem [shape: bf16[4,360,20], index: 1, kind: input, shape index: {}]   ;;  %s2151_s2 = inlined_call_operand.vmem [shape: f32[1,20], index: 2, kind: input, shape index: {}]   ;;  %s2152_s3 = inlined_call_operand.vmem [shape: bf16[32,20], index: 3, kind: output, shape index: {}]  }
   0x1 LB: > { %s1180_s13 = sadd.s32 4294967295, %s1801_s12   ;;  %p1184_p0 = scmp.ge.s32.totalorder %s1801_s12, 1  ;;  %s1801_s12 = sphi %s1823_s12, %s13_s12  }
   0x2   : > { %p139_p1 = scmp.lt.s32.totalorder %s1801_s12, 3 }
   0x4   : > { %p140_p2 = pnand %p1184_p0, %p139_p1 }
   0x5   : > { %s1185_s9 = sshll.u32 (!%p140_p2), %s1180_s13, 1 }
   0x6   : > { %143 = sbr.rel (%p140_p2) target bundleno = 262 (0x106), region = 32  ;;  %p165_p3 = scmp.lt.s32.totalorder (!%p140_p2), %s1185_s9, 3 }
   0xb   : > { %v1704_v0 = vld [vmem:[%s2150_s1 + $0x38] sm:$0xff]  ;;  %v1726_v2 = vld [vmem:[%s2150_s1 + $0xec] sm:$0xff]  ;;  %vm381_vm0 = vcmask 1043456   ;;  %v1725_v7 = vld [vmem:[%s2150_s1 + $0xe4] sm:$0xff]  ;;  %s2154_s9 = smov (!%p165_p3, %s1185_s9), 3  ;;  %vm377_vm1 = vcmask 850944  }
   0xc   : > { %v1712_v1 = vld [vmem:[%s2150_s1 + $0x78] sm:$0xff]  ;;  %v226_v3 = vld [vmem:[%s2150_s1 + $0xb0] sm:$0xf]  ;;  %385 = vmatpush.bf16.msra.mxu0 %v1704_v0  ;;  %611 = vmatpush.bf16.msra.mxu3 %v1726_v2  ;;  %v1702_v10 = vld [vmem:[%s2150_s1 + $0x28] sm:$0xff]  ;;  %s1785_s11 = smul.u32 12, %s2154_s9  ;;  %s1188_s29 = sshll.u32 %s2154_s9, 2 }
   0xd   : > { %399 = vmatpush.bf16.msra.mxu1 %v1712_v1  ;;  %v331_v4 = vunpack.c.l.b16 %v226_v3  ;;  %v1703_v5 = vld [vmem:[%s2150_s1 + $0x30] sm:$0xff]  ;;  %v1710_v11 = vld [vmem:[%s2150_s1 + $0x68] sm:$0xff]  ;;  %v1724_v13 = vld [vmem:[%s2150_s1 + $0xdc] sm:$0xff]  ;;  %s175_s5 = scalar_lea.vmem %s2152_s3, %s1188_s29  ;;  %vm1121_vm2 = vcmask 158720  }
   0xe   : > { %v1711_v6 = vld [vmem:[%s2150_s1 + $0x70] sm:$0xff]  ;;  %v1718_v12 = vld [vmem:[%s2150_s1 + $0xa8] sm:$0xff]  ;;  %v1701_v14 = vld [vmem:[%s2150_s1 + $0x20] sm:$0xff]  ;;  %s169_s23 = scalar_lea.vmem %s2149_s0, %s1785_s11 }
   0xf   : > { %v354_v8 = vpack.c.b16 %v331_v4, %v331_v4  ;;  %v1709_v15 = vld [vmem:[%s2150_s1 + $0x60] sm:$0xff]  ;;  %v1723_v17 = vld [vmem:[%s2150_s1 + $0xd4] sm:$0xff]  ;;  %v1722_v21 = vld [vmem:[%s2150_s1 + $0xcc] sm:$0xff] }
  0x10   : > { %386 = vmatpush.bf16.msra.mxu0 %v1703_v5  ;;  %612 = vmatpush.bf16.msra.mxu3 %v1725_v7  ;;  %v1717_v16 = vld [vmem:[%s2150_s1 + $0xa0] sm:$0xff]  ;;  %v1700_v18 = vld [vmem:[%s2150_s1 + $0x18] sm:$0xff]  ;;  %v1699_v22 = vld [vmem:[%s2150_s1 + $0x10] sm:$0xff] }
  0x11   : > { %v383_v9 = vsel %vm381_vm0, %v354_v8, 0  ;;  %400 = vmatpush.bf16.msra.mxu1 %v1711_v6  ;;  %v1708_v19 = vld [vmem:[%s2150_s1 + $0x58] sm:$0xff]  ;;  %v1707_v23 = vld [vmem:[%s2150_s1 + $0x50] sm:$0xff]  ;;  %v1334_v24 = vld [vmem:[%s2150_s1 + $0x164] sm:$0xf] }
  0x12   : > { %414 = vmatpush.bf16.msra.mxu2 %v383_v9  ;;  %v1716_v20 = vld [vmem:[%s2150_s1 + $0x98] sm:$0xff]  ;;  %v1715_v25 = vld [vmem:[%s2150_s1 + $0x90] sm:$0xff]  ;;  %v1721_v26 = vld [vmem:[%s2150_s1 + $0xc4] sm:$0xff]  ;;  %v562_v27 = vunpack.c.l.b16 %v1334_v24 }
  0x13   : > { %v1698_v28 = vld [vmem:[%s2150_s1 + $0x8] sm:$0xff]  ;;  %v1720_v31 = vld [vmem:[%s2150_s1 + $0xbc] sm:$0xff]  ;;  %v1719_v36 = vld [vmem:[%s2150_s1 + $0xb4] sm:$0xff] }
  0x14   : > { %387 = vmatpush.bf16.msra.mxu0 %v1702_v10  ;;  %613 = vmatpush.bf16.msra.mxu3 %v1724_v13  ;;  %v1706_v29 = vld [vmem:[%s2150_s1 + $0x48] sm:$0xff]  ;;  %v1713_v32 = vld [vmem:[%s2150_s1 + $0x80] sm:$0xff]  ;;  %v585_v34 = vpack.c.b16 %v562_v27, %v562_v27  ;;  %v1696_v38 = vld [vmem:[%s169_s23 + $0x10] sm:$0xf0] }
  0x15   : > { %401 = vmatpush.bf16.msra.mxu1 %v1710_v11  ;;  %v1714_v30 = vld [vmem:[%s2150_s1 + $0x88] sm:$0xff]  ;;  %v1697_v33 = vld [vmem:[%s2150_s1] sm:$0xff]  ;;  %v1193_v43 = vld [vmem:[%s169_s23 + $0xc] sm:$0xf0] }
  0x16   : > { %415 = vmatpush.bf16.msra.mxu2 %v1718_v12  ;;  %v1705_v35 = vld [vmem:[%s2150_s1 + $0x40] sm:$0xff]  ;;  %v1199_v37 = vld [vmem:[%s169_s23 + $0x8] sm:$0xf]  ;;  %v1695_v40 = vld [vmem:[%s169_s23 + $0x8] sm:$0xf0]  ;;  %v609_v44 = vsel %vm381_vm0, %v585_v34, 0 }
  0x17   : > { %v1191_v39 = vld [vmem:[%s169_s23] sm:$0xf]  ;;  %v1734_v41 = vld [vmem:[%s2150_s1 + $0x12c] sm:$0xff]  ;;  %v1694_v42 = vld [vmem:[%s169_s23 + $0x4] sm:$0xf]  ;;  %v1944_v47 = vor.u32 %v1696_v38, %v1199_v37 }
  0x18   : > { %388 = vmatpush.bf16.msra.mxu0 %v1701_v14  ;;  %614 = vmatpush.bf16.msra.mxu3 %v1723_v17  ;;  %v1748_v45 = vld [vmem:[%s2150_s1 + $0x1a0] sm:$0xff]  ;;  %v1946_v48 = vor.u32 %v1695_v40, %v1191_v39  ;;  %v1948_v49 = vor.u32 %v1694_v42, %v1193_v43  ;;  %v1747_v52 = vld [vmem:[%s2150_s1 + $0x198] sm:$0xff]  ;;  %v1746_v56 = vld [vmem:[%s2150_s1 + $0x190] sm:$0xff] }
  0x19   : > { %402 = vmatpush.bf16.msra.mxu1 %v1709_v15  ;;  %v1756_v46 = vld [vmem:[%s2150_s1 + $0x1e0] sm:$0xff]  ;;  %v1755_v53 = vld [vmem:[%s2150_s1 + $0x1d8] sm:$0xff]  ;;  %v1754_v57 = vld [vmem:[%s2150_s1 + $0x1d0] sm:$0xff] }
  0x1a   : > { %416 = vmatpush.bf16.msra.mxu2 %v1717_v16  ;;  %v1733_v50 = vld [vmem:[%s2150_s1 + $0x124] sm:$0xff]  ;;  %v1740_v51 = vld [vmem:[%s2150_s1 + $0x15c] sm:$0xff]  ;;  %v1739_v55 = vld [vmem:[%s2150_s1 + $0x154] sm:$0xff] }
  0x1b   : > { %v1732_v54 = vld [vmem:[%s2150_s1 + $0x11c] sm:$0xff]  ;;  %v1731_v58 = vld [vmem:[%s2150_s1 + $0x114] sm:$0xff]  ;;  %v1738_v59 = vld [vmem:[%s2150_s1 + $0x14c] sm:$0xff] }
  0x1c   : > { %389 = vmatpush.bf16.msra.mxu0 %v1700_v18  ;;  %615 = vmatpush.bf16.msra.mxu3 %v1722_v21  ;;  %v1745_v60 = vld [vmem:[%s2150_s1 + $0x188] sm:$0xff]  ;;  %v1468_v0 = vld [vmem:[%s2150_s1 + $0x218] sm:$0xf]  ;;  %v1744_v1 = vld [vmem:[%s2150_s1 + $0x180] sm:$0xff] }
  0x1d   : > { %403 = vmatpush.bf16.msra.mxu1 %v1708_v19  ;;  %v1753_v61 = vld [vmem:[%s2150_s1 + $0x1c8] sm:$0xff]  ;;  %v1752_v2 = vld [vmem:[%s2150_s1 + $0x1c0] sm:$0xff]  ;;  %v790_v3 = vunpack.c.l.b16 %v1468_v0  ;;  %v1743_v6 = vld [vmem:[%s2150_s1 + $0x178] sm:$0xff] }
  0x1e   : > { %417 = vmatpush.bf16.msra.mxu2 %v1716_v20  ;;  %v1730_v62 = vld [vmem:[%s2150_s1 + $0x10c] sm:$0xff]  ;;  %v1737_v63 = vld [vmem:[%s2150_s1 + $0x144] sm:$0xff]  ;;  %v1736_v5 = vld [vmem:[%s2150_s1 + $0x13c] sm:$0xff] }
  0x1f   : > { %v1729_v4 = vld [vmem:[%s2150_s1 + $0x104] sm:$0xff]  ;;  %v1751_v7 = vld [vmem:[%s2150_s1 + $0x1b8] sm:$0xff]  ;;  %v1602_v8 = vld [vmem:[%s2150_s1 + $0x2cc] sm:$0xf]  ;;  %v813_v9 = vpack.c.b16 %v790_v3, %v790_v3 }
  0x20   : > { %390 = vmatpush.bf16.msra.mxu0 %v1699_v22  ;;  %616 = vmatpush.bf16.msra.mxu3 %v1721_v26  ;;  %v1728_v10 = vld [vmem:[%s2150_s1 + $0xfc] sm:$0xff]  ;;  %v1735_v11 = vld [vmem:[%s2150_s1 + $0x134] sm:$0xff]  ;;  %v1018_v12 = vunpack.c.l.b16 %v1602_v8  ;;  %v1741_v18 = vld [vmem:[%s2150_s1 + $0x168] sm:$0xff] }
  0x21   : > { %404 = vmatpush.bf16.msra.mxu1 %v1707_v23  ;;  %v1742_v13 = vld [vmem:[%s2150_s1 + $0x170] sm:$0xff]  ;;  %v837_v15 = vsel %vm381_vm0, %v813_v9, 0  ;;  %v1749_v19 = vld [vmem:[%s2150_s1 + $0x1a8] sm:$0xff]  ;;  %v1775_v34 = vld [vmem:[%s2150_s1 + $0x27c] sm:$0xff] }
  0x22   : > { %418 = vmatpush.bf16.msra.mxu2 %v1715_v25  ;;  %v1750_v14 = vld [vmem:[%s2150_s1 + $0x1b0] sm:$0xff]  ;;  %v1041_v17 = vpack.c.b16 %v1018_v12, %v1018_v12  ;;  %v1761_v25 = vld [vmem:[%s2150_s1 + $0x208] sm:$0xff] }
  0x23   : > { %v1727_v16 = vld [vmem:[%s2150_s1 + $0xf4] sm:$0xff]  ;;  %v1769_v24 = vld [vmem:[%s2150_s1 + $0x24c] sm:$0xff]  ;;  %v1784_v27 = vld [vmem:[%s2150_s1 + $0x2c4] sm:$0xff] }
  0x24   : > { %391 = vmatpush.bf16.msra.mxu0 %v1698_v28  ;;  %617 = vmatpush.bf16.msra.mxu3 %v1720_v31  ;;  %v1770_v20 = vld [vmem:[%s2150_s1 + $0x254] sm:$0xff]  ;;  %v1065_v23 = vsel %vm381_vm0, %v1041_v17, 0  ;;  %v1777_v26 = vld [vmem:[%s2150_s1 + $0x28c] sm:$0xff]  ;;  %v1768_v28 = vld [vmem:[%s2150_s1 + $0x244] sm:$0xff] }
  0x25   : > { %405 = vmatpush.bf16.msra.mxu1 %v1706_v29  ;;  %v1762_v21 = vld [vmem:[%s2150_s1 + $0x210] sm:$0xff]  ;;  %v1760_v29 = vld [vmem:[%s2150_s1 + $0x200] sm:$0xff] }
  0x26   : > { %419 = vmatpush.bf16.msra.mxu2 %v1714_v30  ;;  %v1778_v22 = vld [vmem:[%s2150_s1 + $0x294] sm:$0xff]  ;;  %v1776_v30 = vld [vmem:[%s2150_s1 + $0x284] sm:$0xff]  ;;  %v1783_v31 = vld [vmem:[%s2150_s1 + $0x2bc] sm:$0xff] }
  0x27   : > { %v1758_v37 = vld [vmem:[%s2150_s1 + $0x1f0] sm:$0xff]  ;;  %v1780_v43 = vld [vmem:[%s2150_s1 + $0x2a4] sm:$0xff]  ;;  %v1794_v17 = vld [vmem:[%s2151_s2] ss:$0 sm:$0xff] }
  0x28   : > { %392 = vmatpush.bf16.msra.mxu0 %v1697_v33  ;;  %618 = vmatpush.bf16.msra.mxu3 %v1719_v36  ;;  %v1759_v33 = vld [vmem:[%s2150_s1 + $0x1f8] sm:$0xff]  ;;  %v1781_v39 = vld [vmem:[%s2150_s1 + $0x2ac] sm:$0xff] }
  0x29   : > { %406 = vmatpush.bf16.msra.mxu1 %v1705_v35  ;;  %v1782_v35 = vld [vmem:[%s2150_s1 + $0x2b4] sm:$0xff]  ;;  %v1765_v40 = vld [vmem:[%s2150_s1 + $0x22c] sm:$0xff] }
  0x2a   : > { %420 = vmatpush.bf16.msra.mxu2 %v1713_v32  ;;  %v1767_v32 = vld [vmem:[%s2150_s1 + $0x23c] sm:$0xff]  ;;  %v1766_v36 = vld [vmem:[%s2150_s1 + $0x234] sm:$0xff]  ;;  %v1773_v42 = vld [vmem:[%s2150_s1 + $0x26c] sm:$0xff] }
  0x2b   : > { %619 = vmatmul.bf16.vlgmr.msra.gmra.mxu3 %v1946_v48  ;;  %393 = vmatmul.bf16.vlgmr.msra.gmra.mxu0 %v1946_v48  ;;  %v1774_v38 = vld [vmem:[%s2150_s1 + $0x274] sm:$0xff] }
  0x2c   : > { %640 = vmatpush.bf16.msrb.mxu0 %v609_v44  ;;  %853 = vmatpush.bf16.msrb.mxu3 %v1756_v46  ;;  %v1764_v44 = vld [vmem:[%s2150_s1 + $0x224] sm:$0xff]  ;;  %v1779_v46 = vld [vmem:[%s2150_s1 + $0x29c] sm:$0xff] }
  0x2d   : > { %839 = vmatpush.bf16.msrb.mxu1 %v1748_v45  ;;  %1289 = vmatmul.msk.bf16.vlgmr.msra.gmra.mxu2 %vm377_vm1, %v1944_v47  ;;  %v1772_v45 = vld [vmem:[%s2150_s1 + $0x264] sm:$0xff] }
  0x2e   : > { %625 = vmatpush.bf16.msrb.mxu2 %v1734_v41  ;;  %407 = vmatmul.bf16.vlgmr.msra.gmra.mxu1 %v1948_v49  ;;  %v1757_v41 = vld [vmem:[%s2150_s1 + $0x1e8] sm:$0xff] }
  0x30   : > { %641 = vmatpush.bf16.msrb.mxu0 %v1740_v51  ;;  %854 = vmatpush.bf16.msrb.mxu3 %v1755_v53  ;;  %v1771_v51 = vld [vmem:[%s2150_s1 + $0x25c] sm:$0xff] }
  0x31   : > { %840 = vmatpush.bf16.msrb.mxu1 %v1747_v52 }
  0x32   : > { %626 = vmatpush.bf16.msrb.mxu2 %v1733_v50  ;;  %v1763_v50 = vld [vmem:[%s2150_s1 + $0x21c] sm:$0xff] }
  0x34   : > { %642 = vmatpush.bf16.msrb.mxu0 %v1739_v55  ;;  %855 = vmatpush.bf16.msrb.mxu3 %v1754_v57 }
  0x35   : > { %841 = vmatpush.bf16.msrb.mxu1 %v1746_v56 }
  0x36   : > { %627 = vmatpush.bf16.msrb.mxu2 %v1732_v54 }
  0x38   : > { %643 = vmatpush.bf16.msrb.mxu0 %v1738_v59  ;;  %856 = vmatpush.bf16.msrb.mxu3 %v1753_v61 }
  0x39   : > { %842 = vmatpush.bf16.msrb.mxu1 %v1745_v60 }
  0x3a   : > { %628 = vmatpush.bf16.msrb.mxu2 %v1731_v58 }
  0x3c   : > { %644 = vmatpush.bf16.msrb.mxu0 %v1737_v63  ;;  %857 = vmatpush.bf16.msrb.mxu3 %v1752_v2 }
  0x3d   : > { %843 = vmatpush.bf16.msrb.mxu1 %v1744_v1 }
  0x3e   : > { %629 = vmatpush.bf16.msrb.mxu2 %v1730_v62 }
  0x40   : > { %645 = vmatpush.bf16.msrb.mxu0 %v1736_v5  ;;  %858 = vmatpush.bf16.msrb.mxu3 %v1751_v7 }
  0x41   : > { %844 = vmatpush.bf16.msrb.mxu1 %v1743_v6 }
  0x42   : > { %630 = vmatpush.bf16.msrb.mxu2 %v1729_v4 }
  0x44   : > { %646 = vmatpush.bf16.msrb.mxu0 %v1735_v11  ;;  %859 = vmatpush.bf16.msrb.mxu3 %v1750_v14 }
  0x45   : > { %845 = vmatpush.bf16.msrb.mxu1 %v1742_v13 }
  0x46   : > { %631 = vmatpush.bf16.msrb.mxu2 %v1728_v10 }
  0x47   : > { %1423 = vmatmul.msk.bf16.vlgmr.msrb.gmra.mxu0 %vm377_vm1, %v1944_v47 }
  0x48   : > { %868 = vmatpush.bf16.msra.mxu0 %v837_v15  ;;  %860 = vmatpush.bf16.msrb.mxu3 %v1749_v19 }
  0x49   : > { %846 = vmatpush.bf16.msrb.mxu1 %v1741_v18 }
  0x4a   : > { %632 = vmatpush.bf16.msrb.mxu2 %v1727_v16 }
  0x4b   : > { %861 = vmatmul.bf16.vlgmr.msrb.gmra.mxu3 %v1948_v49 }
  0x4c   : > { %869 = vmatpush.bf16.msra.mxu0 %v1762_v21  ;;  %1096 = vmatpush.bf16.msra.mxu3 %v1065_v23 }
  0x4d   : > { %1081 = vmatpush.bf16.msra.mxu1 %v1778_v22  ;;  %633 = vmatmul.bf16.vlgmr.msrb.gmra.mxu2 %v1948_v49 }
  0x4e   : > { %1067 = vmatpush.bf16.msra.mxu2 %v1770_v20  ;;  %847 = vmatmul.bf16.vlgmr.msrb.gmra.mxu1 %v1946_v48 }
  0x50   : > { %870 = vmatpush.bf16.msra.mxu0 %v1761_v25  ;;  %1097 = vmatpush.bf16.msra.mxu3 %v1784_v27 }
  0x51   : > { %1082 = vmatpush.bf16.msra.mxu1 %v1777_v26 }
  0x52   : > { %1068 = vmatpush.bf16.msra.mxu2 %v1769_v24 }
  0x54   : > { %871 = vmatpush.bf16.msra.mxu0 %v1760_v29  ;;  %1098 = vmatpush.bf16.msra.mxu3 %v1783_v31 }
  0x55   : > { %1083 = vmatpush.bf16.msra.mxu1 %v1776_v30 }
  0x56   : > { %1069 = vmatpush.bf16.msra.mxu2 %v1768_v28 }
  0x58   : > { %872 = vmatpush.bf16.msra.mxu0 %v1759_v33  ;;  %1099 = vmatpush.bf16.msra.mxu3 %v1782_v35 }
  0x59   : > { %1084 = vmatpush.bf16.msra.mxu1 %v1775_v34 }
  0x5a   : > { %1070 = vmatpush.bf16.msra.mxu2 %v1767_v32 }
  0x5c   : > { %873 = vmatpush.bf16.msra.mxu0 %v1758_v37  ;;  %1100 = vmatpush.bf16.msra.mxu3 %v1781_v39 }
  0x5d   : > { %1085 = vmatpush.bf16.msra.mxu1 %v1774_v38 }
  0x5e   : > { %1071 = vmatpush.bf16.msra.mxu2 %v1766_v36 }
  0x60   : > { %874 = vmatpush.bf16.msra.mxu0 %v1757_v41  ;;  %1101 = vmatpush.bf16.msra.mxu3 %v1780_v43 }
  0x61   : > { %1086 = vmatpush.bf16.msra.mxu1 %v1773_v42 }
  0x62   : > { %1072 = vmatpush.bf16.msra.mxu2 %v1765_v40 }
  0x63   : > { %1557 = vmatmul.msk.bf16.vlgmr.msra.gmra.mxu0 %vm377_vm1, %v1944_v47 }
  0x64   : > { %1102 = vmatpush.bf16.msra.mxu3 %v1779_v46 }
  0x65   : > { %1087 = vmatpush.bf16.msra.mxu1 %v1772_v45 }
  0x66   : > { %1073 = vmatpush.bf16.msra.mxu2 %v1764_v44 }
  0x67   : > { %1691 = vmatmul.msk.bf16.vlgmr.msra.gmra.mxu3 %vm377_vm1, %v1944_v47 }
  0x69   : > { %1088 = vmatpush.bf16.msra.mxu1 %v1771_v51 }
  0x6a   : > { %1074 = vmatpush.bf16.msra.mxu2 %v1763_v50 }
  0x6c   : > { %1089 = vmatmul.bf16.vlgmr.msra.gmra.mxu1 %v1948_v49 }
  0x6d   : > { %1075 = vmatmul.bf16.vlgmr.msra.gmra.mxu2 %v1946_v48 }
  0xa8   : > { %v394_v52 = vpop.f32.mrf.mxu0 }
  0xab   : > { %v408_v53 = vpop.f32.mrf.mxu1 }
  0xac   : > { %v409_v4 = vadd.f32 %v408_v53, %v394_v52 }
  0xae   : > { %v620_v55 = vpop.f32.mrf.mxu3 }
  0xb0   : > { %v422_v54 = vpop.f32.mrf.mxu2  ;;  %v396_v56 = vpop.f32.mrf.mxu0 }
  0xb1   : > { %v423_v7 = vadd.f32 %v422_v54, %v409_v4 }
  0xb3   : > { %v410_v57 = vpop.f32.mrf.mxu1 }
  0xb4   : > { %v411_v14 = vadd.f32 %v410_v57, %v396_v56 }
  0xb6   : > { %v622_v59 = vpop.f32.mrf.mxu3 }
  0xb8   : > { %v424_v58 = vpop.f32.mrf.mxu2 }
  0xb9   : > { %v425_v22 = vadd.f32 %v424_v58, %v411_v14 }
  0xc4   : > { %v648_v60 = vpop.f32.mrf.mxu0 }
  0xcb   : > { %v848_v61 = vpop.f32.mrf.mxu1 }
  0xcc   : > { %v650_v0 = vpop.f32.mrf.mxu0 }
  0xce   : > { %v862_v63 = vpop.f32.mrf.mxu3 }
  0xcf   : > { %v863_v49 = vadd.f32 %v862_v63, %v848_v61 }
  0xd0   : > { %v634_v62 = vpop.f32.mrf.mxu2 }
  0xd1   : > { %v635_v3 = vadd.f32 %v634_v62, %v620_v55 }
  0xd3   : > { %v850_v1 = vpop.f32.mrf.mxu1  ;;  %v649_v5 = vadd.f32 %v648_v60, %v635_v3 }
  0xd5   : > { %v653_v11 = vmax.f32 %v423_v7, %v649_v5 }
  0xd6   : > { %v864_v2 = vpop.f32.mrf.mxu3 }
  0xd7   : > { %v865_v20 = vadd.f32 %v864_v2, %v850_v1 }
  0xd8   : > { %v636_v47 = vpop.f32.mrf.mxu2 }
  0xd9   : > { %v637_v12 = vadd.f32 %v636_v47, %v622_v59 }
  0xdb   : > { %v651_v19 = vadd.f32 %v650_v0, %v637_v12 }
  0xdd   : > { %v654_v27 = vmax.f32 %v425_v22, %v651_v19 }
  0xe0   : > { %v876_v48 = vpop.f32.mrf.mxu0 }
  0xe1   : > { %v877_v8 = vadd.f32 %v876_v48, %v863_v49 }
  0xe3   : > { %v881_v15 = vmax.f32 %v653_v11, %v877_v8 }
  0xe8   : > { %v878_v18 = vpop.f32.mrf.mxu0 }
  0xe9   : > { %v1090_v6 = vpop.f32.mrf.mxu1  ;;  %v879_v23 = vadd.f32 %v878_v18, %v865_v20 }
  0xea   : > { %v1104_v9 = vpop.f32.mrf.mxu3 }
  0xeb   : > { %v882_v31 = vmax.f32 %v654_v27, %v879_v23 }
  0xf0   : > { %v1076_v10 = vpop.f32.mrf.mxu2 }
  0xf1   : > { %v1091_v13 = vadd.f32 %v1090_v6, %v1076_v10  ;;  %v1092_v25 = vpop.f32.mrf.mxu1 }
  0xf2   : > { %v1106_v30 = vpop.f32.mrf.mxu3 }
  0xf3   : > { %v1105_v16 = vadd.f32 %v1104_v9, %v1091_v13 }
  0xf5   : > { %v1109_v21 = vmax.f32 %v881_v15, %v1105_v16 }
  0xf7   : > { %v1115_v24 = vadd.f32 %v1794_v17, %v1109_v21 }
  0xf8   : > { %v1078_v26 = vpop.f32.mrf.mxu2 }
  0xf9   : > { %v1117_v28 = vmax.f32 %v1115_v24, 0.0  ;;  %v1093_v29 = vadd.f32 %v1092_v25, %v1078_v26 }
  0xfb   : > { %v1119_v32 = vpack.c.bf16 %v1117_v28, %v1117_v28  ;;  %v1107_v33 = vadd.f32 %v1106_v30, %v1093_v29 }
  0xfd   : > { %1122 = vst.msk [vmem:[%s175_s5] sm:$0xf] %vm1121_vm2, %v1119_v32  ;;  %v1110_v34 = vmax.f32 %v882_v31, %v1107_v33 }
  0xff   : > { %v1116_v35 = vadd.f32 %v1794_v17, %v1110_v34 }
 0x101   : > { %v1118_v36 = vmax.f32 %v1116_v35, 0.0 }
 0x103   : > { %v1120_v37 = vpack.c.bf16 %v1118_v36, %v1118_v36 }
 0x105   : > { %1123 = vst.msk [vmem:[%s175_s5 + $0x4] sm:$0xf] %vm1121_vm2, %v1120_v37 }
 0x106 PF: > { %s13_s12 = sadd.s32 1, %s1801_s12  }
 0x107   : > { %p10_p4 = scmp.ge.s32.totalorder %s13_s12, 4  }
 0x109   :  { %12 = sbr.rel (!%p10_p4) target bundleno = 1 (0x1), region = 65 }

// kernel: cnn_forward.5
= control target key start
LH: loop header
LB: loop body
LE: loop exit
PB: predicated region body
PF: predicated region fallthrough
CT: control target
= control target key end

     0   :  { %vm205_vm0 = vcmask 523264   ;;  %vm886_vm1 = vcmask 1043456   ;;  %vm882_vm2 = vcmask 326656   ;;  %vm1004_vm3 = vcmask 1040384   ;;  %s1996_s1 = inlined_call_operand.vmem [shape: bf16[4,320,40], index: 1, kind: input, shape index: {}]   ;;  %s1997_s0 = inlined_call_operand.vmem [shape: bf16[8,320], index: 0, kind: input, shape index: {}]   ;;  %s1998_s2 = inlined_call_operand.vmem [shape: f32[1,40], index: 2, kind: input, shape index: {}]   ;;  %s1999_s4 = inlined_call_operand.vmem [shape: f32[1,80], index: 4, kind: input, shape index: {}]   ;;  %s2000_s3 = inlined_call_operand.vmem [shape: bf16[40,80], index: 3, kind: input, shape index: {}]   ;;  %s2001_s5 = inlined_call_operand.vmem [shape: bf16[80,50], index: 5, kind: input, shape index: {}]   ;;  %s2002_s6 = inlined_call_operand.vmem [shape: f32[1,50], index: 6, kind: input, shape index: {}]   ;;  %s2003_s7 = inlined_call_operand.vmem [shape: bf16[50,10], index: 7, kind: input, shape index: {}]   ;;  %s2004_s8 = inlined_call_operand.vmem [shape: f32[1,10], index: 8, kind: input, shape index: {}]   ;;  %s2005_s9 = inlined_call_operand.vmem [shape: f32[8,10], index: 9, kind: output, shape index: {}]  }
   0x1   :  { %v1533_v0 = vld [vmem:[%s1996_s1 + $0x38] sm:$0xff]  ;;  %v1532_v3 = vld [vmem:[%s1996_s1 + $0x30] sm:$0xff]  ;;  %v1531_v8 = vld [vmem:[%s1996_s1 + $0x28] sm:$0xff]  ;;  %vm949_vm4 = vcmask 654336   ;;  %vm1000_vm5 = vcmask 408576   ;;  %vm1021_vm6 = vcmask 80896  }
   0x2   :  { %v1545_v1 = vld [vmem:[%s1996_s1 + $0x98] sm:$0xff]  ;;  %209 = vmatpush.bf16.msra.mxu0 %v1533_v0  ;;  %v1544_v4 = vld [vmem:[%s1996_s1 + $0x90] sm:$0xff]  ;;  %v1543_v9 = vld [vmem:[%s1996_s1 + $0x88] sm:$0xff] }
   0x3   :  { %v1553_v2 = vld [vmem:[%s1996_s1 + $0xd8] sm:$0xff]  ;;  %239 = vmatpush.bf16.msra.mxu2 %v1545_v1  ;;  %v1552_v6 = vld [vmem:[%s1996_s1 + $0xd0] sm:$0xff]  ;;  %v1551_v10 = vld [vmem:[%s1996_s1 + $0xc8] sm:$0xff] }
   0x4   :  { %v1541_v5 = vld [vmem:[%s1996_s1 + $0x78] sm:$0xff]  ;;  %409 = vmatpush.bf16.msra.mxu3 %v1553_v2  ;;  %v1540_v7 = vld [vmem:[%s1996_s1 + $0x70] sm:$0xff]  ;;  %v1539_v11 = vld [vmem:[%s1996_s1 + $0x68] sm:$0xff] }
   0x5   :  { %222 = vmatpush.bf16.msra.mxu1 %v1541_v5  ;;  %v34_v12 = vld [vmem:[%s1997_s0 + $0x8] sm:$0xf]  ;;  %v1530_v13 = vld [vmem:[%s1996_s1 + $0x20] sm:$0xff]  ;;  %v1561_v17 = vld [vmem:[%s1996_s1 + $0x118] sm:$0xff] }
   0x6   :  { %210 = vmatpush.bf16.msra.mxu0 %v1532_v3  ;;  %v1542_v14 = vld [vmem:[%s1996_s1 + $0x80] sm:$0xff]  ;;  %v79_v15 = vunpack.c.l.b16 %v34_v12  ;;  %v1529_v20 = vld [vmem:[%s1996_s1 + $0x18] sm:$0xff]  ;;  %v1560_v22 = vld [vmem:[%s1996_s1 + $0x110] sm:$0xff] }
   0x7   :  { %240 = vmatpush.bf16.msra.mxu2 %v1544_v4  ;;  %v1550_v16 = vld [vmem:[%s1996_s1 + $0xc0] sm:$0xff]  ;;  %v1549_v21 = vld [vmem:[%s1996_s1 + $0xb8] sm:$0xff]  ;;  %v1528_v24 = vld [vmem:[%s1996_s1 + $0x10] sm:$0xff] }
   0x8   :  { %410 = vmatpush.bf16.msra.mxu3 %v1552_v6  ;;  %v1538_v18 = vld [vmem:[%s1996_s1 + $0x60] sm:$0xff]  ;;  %v1728_v19 = vpack.c.b16 %v79_v15, %v79_v15  ;;  %v1537_v23 = vld [vmem:[%s1996_s1 + $0x58] sm:$0xff]  ;;  %v1548_v25 = vld [vmem:[%s1996_s1 + $0xb0] sm:$0xff] }
   0x9   :  { %223 = vmatpush.bf16.msra.mxu1 %v1540_v7  ;;  %v1559_v26 = vld [vmem:[%s1996_s1 + $0x108] sm:$0xff]  ;;  %v1536_v27 = vld [vmem:[%s1996_s1 + $0x50] sm:$0xff]  ;;  %v33_v29 = vld [vmem:[%s1997_s0] sm:$0xff] }
   0xa   :  { %211 = vmatpush.bf16.msra.mxu0 %v1531_v8  ;;  %v1527_v28 = vld [vmem:[%s1996_s1 + $0x8] sm:$0xff]  ;;  %v1558_v31 = vld [vmem:[%s1996_s1 + $0x100] sm:$0xff]  ;;  %v77_v33 = vunpack.c.l.b16 %v33_v29  ;;  %v1557_v36 = vld [vmem:[%s1996_s1 + $0xf8] sm:$0xff]  ;;  %v78_v41 = vunpack.c.h.b16 %v33_v29 }
   0xb   :  { %241 = vmatpush.bf16.msra.mxu2 %v1543_v9  ;;  %v1547_v30 = vld [vmem:[%s1996_s1 + $0xa8] sm:$0xff]  ;;  %v1526_v34 = vld [vmem:[%s1996_s1] sm:$0xff]  ;;  %v1565_v37 = vld [vmem:[%s1996_s1 + $0x138] sm:$0xff] }
   0xc   :  { %411 = vmatpush.bf16.msra.mxu3 %v1551_v10  ;;  %v1535_v32 = vld [vmem:[%s1996_s1 + $0x48] sm:$0xff]  ;;  %v1546_v35 = vld [vmem:[%s1996_s1 + $0xa0] sm:$0xff]  ;;  %v1581_v38 = vld [vmem:[%s1996_s1 + $0x1b8] sm:$0xff]  ;;  %v1786_v39 = vpack.c.b16 %v77_v33, %v77_v33  ;;  %v1804_v46 = vpack.c.b16 %v78_v41, %v78_v41 }
   0xd   :  { %224 = vmatpush.bf16.msra.mxu1 %v1539_v11  ;;  %v1534_v40 = vld [vmem:[%s1996_s1 + $0x40] sm:$0xff]  ;;  %v1573_v42 = vld [vmem:[%s1996_s1 + $0x178] sm:$0xff]  ;;  %v1556_v43 = vld [vmem:[%s1996_s1 + $0xf0] sm:$0xff] }
   0xe   :  { %212 = vmatpush.bf16.msra.mxu0 %v1530_v13  ;;  %v1564_v44 = vld [vmem:[%s1996_s1 + $0x130] sm:$0xff]  ;;  %v1555_v48 = vld [vmem:[%s1996_s1 + $0xe8] sm:$0xff]  ;;  %v1554_v52 = vld [vmem:[%s1996_s1 + $0xe0] sm:$0xff] }
   0xf   :  { %242 = vmatpush.bf16.msra.mxu2 %v1542_v14  ;;  %v1580_v45 = vld [vmem:[%s1996_s1 + $0x1b0] sm:$0xff]  ;;  %v1563_v49 = vld [vmem:[%s1996_s1 + $0x128] sm:$0xff]  ;;  %v1562_v53 = vld [vmem:[%s1996_s1 + $0x120] sm:$0xff] }
  0x10   :  { %412 = vmatpush.bf16.msra.mxu3 %v1550_v16  ;;  %v1572_v47 = vld [vmem:[%s1996_s1 + $0x170] sm:$0xff]  ;;  %v1579_v50 = vld [vmem:[%s1996_s1 + $0x1a8] sm:$0xff]  ;;  %v1578_v54 = vld [vmem:[%s1996_s1 + $0x1a0] sm:$0xff] }
  0x11   :  { %225 = vmatpush.bf16.msra.mxu1 %v1538_v18  ;;  %v1571_v51 = vld [vmem:[%s1996_s1 + $0x168] sm:$0xff]  ;;  %v1585_v55 = vld [vmem:[%s1996_s1 + $0x1d8] sm:$0xff]  ;;  %v1570_v57 = vld [vmem:[%s1996_s1 + $0x160] sm:$0xff] }
  0x12   :  { %1119 = vmatmul.msk.bf16.vlgmr.msra.gmra.mxu2 %vm205_vm0, %v1728_v19  ;;  %213 = vmatpush.bf16.msra.mxu0 %v1529_v20  ;;  %v1593_v56 = vld [vmem:[%s1996_s1 + $0x218] sm:$0xff]  ;;  %v1584_v59 = vld [vmem:[%s1996_s1 + $0x1d0] sm:$0xff]  ;;  %v1583_v63 = vld [vmem:[%s1996_s1 + $0x1c8] sm:$0xff] }
  0x13   :  { %422 = vmatpush.bf16.msrb.mxu2 %v1561_v17  ;;  %v1577_v58 = vld [vmem:[%s1996_s1 + $0x198] sm:$0xff]  ;;  %v1592_v60 = vld [vmem:[%s1996_s1 + $0x210] sm:$0xff]  ;;  %v1591_v0 = vld [vmem:[%s1996_s1 + $0x208] sm:$0xff] }
  0x14   :  { %413 = vmatpush.bf16.msra.mxu3 %v1549_v21  ;;  %v1569_v61 = vld [vmem:[%s1996_s1 + $0x158] sm:$0xff]  ;;  %v1576_v62 = vld [vmem:[%s1996_s1 + $0x190] sm:$0xff]  ;;  %v1575_v2 = vld [vmem:[%s1996_s1 + $0x188] sm:$0xff] }
  0x15   :  { %226 = vmatpush.bf16.msra.mxu1 %v1537_v23  ;;  %v1568_v1 = vld [vmem:[%s1996_s1 + $0x150] sm:$0xff]  ;;  %v1582_v3 = vld [vmem:[%s1996_s1 + $0x1c0] sm:$0xff]  ;;  %v1601_v5 = vld [vmem:[%s1996_s1 + $0x258] sm:$0xff] }
  0x16   :  { %214 = vmatpush.bf16.msra.mxu0 %v1528_v24  ;;  %v1590_v4 = vld [vmem:[%s1996_s1 + $0x200] sm:$0xff]  ;;  %v1567_v6 = vld [vmem:[%s1996_s1 + $0x148] sm:$0xff]  ;;  %v1589_v8 = vld [vmem:[%s1996_s1 + $0x1f8] sm:$0xff] }
  0x17   :  { %423 = vmatpush.bf16.msrb.mxu2 %v1560_v22  ;;  %v1574_v7 = vld [vmem:[%s1996_s1 + $0x180] sm:$0xff]  ;;  %v1605_v9 = vld [vmem:[%s1996_s1 + $0x278] sm:$0xff]  ;;  %v1600_v10 = vld [vmem:[%s1996_s1 + $0x250] sm:$0xff] }
  0x18   :  { %414 = vmatpush.bf16.msra.mxu3 %v1548_v25  ;;  %v1566_v11 = vld [vmem:[%s1996_s1 + $0x140] sm:$0xff]  ;;  %v1588_v12 = vld [vmem:[%s1996_s1 + $0x1f0] sm:$0xff]  ;;  %v1599_v14 = vld [vmem:[%s1996_s1 + $0x248] sm:$0xff] }
  0x19   :  { %227 = vmatpush.bf16.msra.mxu1 %v1536_v27  ;;  %v1604_v13 = vld [vmem:[%s1996_s1 + $0x270] sm:$0xff]  ;;  %v1587_v15 = vld [vmem:[%s1996_s1 + $0x1e8] sm:$0xff]  ;;  %v1598_v17 = vld [vmem:[%s1996_s1 + $0x240] sm:$0xff] }
  0x1a   :  { %215 = vmatpush.bf16.msra.mxu0 %v1527_v28  ;;  %v1603_v16 = vld [vmem:[%s1996_s1 + $0x268] sm:$0xff]  ;;  %v1586_v18 = vld [vmem:[%s1996_s1 + $0x1e0] sm:$0xff]  ;;  %v1597_v21 = vld [vmem:[%s1996_s1 + $0x238] sm:$0xff] }
  0x1b   :  { %424 = vmatpush.bf16.msrb.mxu2 %v1559_v26  ;;  %v1602_v20 = vld [vmem:[%s1996_s1 + $0x260] sm:$0xff]  ;;  %v1596_v22 = vld [vmem:[%s1996_s1 + $0x230] sm:$0xff]  ;;  %v1595_v23 = vld [vmem:[%s1996_s1 + $0x228] sm:$0xff] }
  0x1c   :  { %415 = vmatpush.bf16.msra.mxu3 %v1547_v30  ;;  %v1594_v24 = vld [vmem:[%s1996_s1 + $0x220] sm:$0xff] }
  0x1d   :  { %228 = vmatpush.bf16.msra.mxu1 %v1535_v32 }
  0x1e   :  { %216 = vmatpush.bf16.msra.mxu0 %v1526_v34  ;;  %v862_v34 = vld [vmem:[%s2000_s3 + $0x10] sm:$0xf] }
  0x1f   :  { %425 = vmatpush.bf16.msrb.mxu2 %v1558_v31 }
  0x20   :  { %416 = vmatpush.bf16.msra.mxu3 %v1546_v35  ;;  %v876_v35 = vunpack.c.l.b16 %v862_v34 }
  0x21   :  { %217 = vmatmul.bf16.vlgmr.msra.gmra.mxu0 %v1786_v39  ;;  %229 = vmatpush.bf16.msra.mxu1 %v1534_v40  ;;  %v1607_v40 = vld [vmem:[%s2000_s3 + $0x8] sm:$0xff] }
  0x22   :  { %439 = vmatpush.bf16.msrb.mxu0 %v1565_v37 }
  0x23   :  { %426 = vmatpush.bf16.msrb.mxu2 %v1557_v36  ;;  %417 = vmatmul.bf16.vlgmr.msra.gmra.mxu3 %v1786_v39  ;;  %v879_v36 = vpack.c.b16 %v876_v35, %v876_v35 }
  0x24   :  { %623 = vmatpush.bf16.msrb.mxu3 %v1581_v38  ;;  %230 = vmatmul.bf16.vlgmr.msra.gmra.mxu1 %v1804_v46 }
  0x25   :  { %610 = vmatpush.bf16.msrb.mxu1 %v1573_v42  ;;  %v888_v38 = vsel %vm886_vm1, %v879_v36, 0 }
  0x26   :  { %440 = vmatpush.bf16.msrb.mxu0 %v1564_v44 }
  0x27   :  { %427 = vmatpush.bf16.msrb.mxu2 %v1556_v43  ;;  %v1606_v43 = vld [vmem:[%s2000_s3] sm:$0xff] }
  0x28   :  { %624 = vmatpush.bf16.msrb.mxu3 %v1580_v45  ;;  %v1612_v45 = vld [vmem:[%s2001_s5 + $0x20] sm:$0xff] }
  0x29   :  { %611 = vmatpush.bf16.msrb.mxu1 %v1572_v47 }
  0x2a   :  { %441 = vmatpush.bf16.msrb.mxu0 %v1563_v49 }
  0x2b   :  { %428 = vmatpush.bf16.msrb.mxu2 %v1555_v48 }
  0x2c   :  { %625 = vmatpush.bf16.msrb.mxu3 %v1579_v50  ;;  %v1610_v50 = vld [vmem:[%s2001_s5 + $0x10] sm:$0xff] }
  0x2d   :  { %612 = vmatpush.bf16.msrb.mxu1 %v1571_v51 }
  0x2e   :  { %442 = vmatpush.bf16.msrb.mxu0 %v1562_v53 }
  0x2f   :  { %429 = vmatpush.bf16.msrb.mxu2 %v1554_v52 }
  0x30   :  { %626 = vmatpush.bf16.msrb.mxu3 %v1578_v54 }
  0x31   :  { %613 = vmatpush.bf16.msrb.mxu1 %v1570_v57  ;;  %1240 = vmatmul.msk.bf16.vlgmr.msrb.gmra.mxu0 %vm205_vm0, %v1728_v19 }
  0x32   :  { %640 = vmatpush.bf16.msra.mxu0 %v1585_v55  ;;  %430 = vmatmul.bf16.vlgmr.msrb.gmra.mxu2 %v1804_v46 }
  0x33   :  { %811 = vmatpush.bf16.msra.mxu2 %v1593_v56 }
  0x34   :  { %627 = vmatpush.bf16.msrb.mxu3 %v1577_v58 }
  0x35   :  { %614 = vmatpush.bf16.msrb.mxu1 %v1569_v61 }
  0x36   :  { %641 = vmatpush.bf16.msra.mxu0 %v1584_v59 }
  0x37   :  { %812 = vmatpush.bf16.msra.mxu2 %v1592_v60 }
  0x38   :  { %628 = vmatpush.bf16.msrb.mxu3 %v1576_v62 }
  0x39   :  { %615 = vmatpush.bf16.msrb.mxu1 %v1568_v1  ;;  %v1616_v1 = vld [vmem:[%s1998_s2] ss:$0 sm:$0xff] }
  0x3a   :  { %642 = vmatpush.bf16.msra.mxu0 %v1583_v63 }
  0x3b   :  { %813 = vmatpush.bf16.msra.mxu2 %v1591_v0 }
  0x3c   :  { %629 = vmatpush.bf16.msrb.mxu3 %v1575_v2 }
  0x3d   :  { %616 = vmatpush.bf16.msrb.mxu1 %v1567_v6 }
  0x3e   :  { %643 = vmatpush.bf16.msra.mxu0 %v1582_v3 }
  0x3f   :  { %814 = vmatpush.bf16.msra.mxu2 %v1590_v4 }
  0x40   :  { %630 = vmatpush.bf16.msrb.mxu3 %v1574_v7 }
  0x41   :  { %617 = vmatpush.bf16.msrb.mxu1 %v1566_v11  ;;  %1361 = vmatmul.msk.bf16.vlgmr.msra.gmra.mxu0 %vm205_vm0, %v1728_v19 }
  0x42   :  { %824 = vmatpush.bf16.msrb.mxu0 %v1601_v5 }
  0x43   :  { %815 = vmatpush.bf16.msra.mxu2 %v1589_v8  ;;  %631 = vmatmul.bf16.vlgmr.msrb.gmra.mxu3 %v1804_v46  ;;  %v1609_v8 = vld [vmem:[%s2001_s5 + $0x8] sm:$0xff] }
  0x44   :  { %841 = vmatpush.bf16.msra.mxu3 %v1605_v9  ;;  %618 = vmatmul.bf16.vlgmr.msrb.gmra.mxu1 %v1786_v39  ;;  %v1608_v9 = vld [vmem:[%s2001_s5] sm:$0xff] }
  0x45   :  { %956 = vmatpush.bf16.msra.mxu1 %v1612_v45 }
  0x46   :  { %825 = vmatpush.bf16.msrb.mxu0 %v1600_v10  ;;  %v974_v10 = vld [vmem:[%s2003_s7 + $0x18] sm:$0x1] }
  0x47   :  { %816 = vmatpush.bf16.msra.mxu2 %v1588_v12  ;;  %v992_v11 = vunpack.c.l.b16 %v974_v10 }
  0x48   :  { %842 = vmatpush.bf16.msra.mxu3 %v1604_v13 }
  0x49   :  { %v996_v12 = vpack.c.b16 %v992_v11, %v992_v11 }
  0x4a   :  { %826 = vmatpush.bf16.msrb.mxu0 %v1599_v14  ;;  %v1615_v14 = vld [vmem:[%s2003_s7 + $0x10] sm:$0xff] }
  0x4b   :  { %817 = vmatpush.bf16.msra.mxu2 %v1587_v15  ;;  %v1006_v13 = vsel %vm1004_vm3, %v996_v12, 0  ;;  %v1614_v15 = vld [vmem:[%s2003_s7 + $0x8] sm:$0xff] }
  0x4c   :  { %843 = vmatpush.bf16.msra.mxu3 %v1603_v16  ;;  %v1617_v16 = vld [vmem:[%s1999_s4] ss:$0 sm:$0xff] }
  0x4e   :  { %827 = vmatpush.bf16.msrb.mxu0 %v1598_v17 }
  0x4f   :  { %818 = vmatpush.bf16.msra.mxu2 %v1586_v18 }
  0x50   :  { %844 = vmatpush.bf16.msra.mxu3 %v1602_v20 }
  0x52   :  { %828 = vmatpush.bf16.msrb.mxu0 %v1597_v21  ;;  %819 = vmatmul.bf16.vlgmr.msra.gmra.mxu2 %v1786_v39 }
  0x53   :  { %1482 = vmatmul.msk.bf16.vlgmr.msra.gmra.mxu3 %vm205_vm0, %v1728_v19  ;;  %1012 = vmatpush.bf16.msrb.mxu2 %v1006_v13 }
  0x54   :  { %895 = vmatpush.bf16.msrb.mxu3 %v888_v38 }
  0x56   :  { %829 = vmatpush.bf16.msrb.mxu0 %v1596_v22 }
  0x57   :  { %1013 = vmatpush.bf16.msrb.mxu2 %v1615_v14 }
  0x58   :  { %896 = vmatpush.bf16.msrb.mxu3 %v1607_v40 }
  0x5a   :  { %830 = vmatpush.bf16.msrb.mxu0 %v1595_v23  ;;  %v1613_v23 = vld [vmem:[%s2003_s7] sm:$0xff] }
  0x5b   :  { %1014 = vmatpush.bf16.msrb.mxu2 %v1614_v15 }
  0x5c   :  { %897 = vmatpush.bf16.msrb.mxu3 %v1606_v43 }
  0x5e   :  { %831 = vmatpush.bf16.msrb.mxu0 %v1594_v24  ;;  %v1618_v24 = vld [vmem:[%s2002_s6] ss:$0 sm:$0xff] }
  0x5f   :  { %1015 = vmatpush.bf16.msrb.mxu2 %v1613_v23 }
  0x61   :  { %832 = vmatmul.bf16.vlgmr.msrb.gmra.mxu0 %v1804_v46  ;;  %v1611_v46 = vld [vmem:[%s2001_s5 + $0x18] sm:$0xff] }
  0x62   :  { %957 = vmatpush.bf16.msra.mxu1 %v1611_v46 }
  0x66   :  { %958 = vmatpush.bf16.msra.mxu1 %v1610_v50 }
  0x6a   :  { %959 = vmatpush.bf16.msra.mxu1 %v1609_v8 }
  0x6e   :  { %960 = vmatpush.bf16.msra.mxu1 %v1608_v9 }
  0x95   :  { %v244_v25 = vpop.f32.mrf.mxu2 }
  0x9d   :  { %v246_v26 = vpop.f32.mrf.mxu2 }
  0x9e   :  { %v218_v27 = vpop.f32.mrf.mxu0 }
  0xa1   :  { %v231_v28 = vpop.f32.mrf.mxu1 }
  0xa2   :  { %v232_v53 = vadd.f32 %v231_v28, %v218_v27 }
  0xa4   :  { %v245_v57 = vadd.f32 %v244_v25, %v232_v53 }
  0xa6   :  { %v418_v29 = vpop.f32.mrf.mxu3  ;;  %v220_v30 = vpop.f32.mrf.mxu0 }
  0xa7   :  { %v1619_v30 = vld [vmem:[%s2004_s8] ss:$0 sm:$0xff] }
  0xa9   :  { %v233_v31 = vpop.f32.mrf.mxu1 }
  0xae   :  { %v420_v19 = vpop.f32.mrf.mxu3  ;;  %v444_v32 = vpop.f32.mrf.mxu0 }
  0xb5   :  { %v431_v33 = vpop.f32.mrf.mxu2 }
  0xb6   :  { %v446_v37 = vpop.f32.mrf.mxu0  ;;  %v432_v52 = vadd.f32 %v431_v33, %v418_v29 }
  0xb8   :  { %v445_v56 = vadd.f32 %v444_v32, %v432_v52 }
  0xba   :  { %v448_v61 = vmax.f32 %v245_v57, %v445_v56 }
  0xbd   :  { %v433_v39 = vpop.f32.mrf.mxu2 }
  0xbe   :  { %v645_v41 = vpop.f32.mrf.mxu0 }
  0xc1   :  { %v619_v42 = vpop.f32.mrf.mxu1 }
  0xc6   :  { %v632_v44 = vpop.f32.mrf.mxu3  ;;  %v647_v47 = vpop.f32.mrf.mxu0 }
  0xc7   :  { %v633_v54 = vadd.f32 %v632_v44, %v619_v42 }
  0xc9   :  { %v621_v48 = vpop.f32.mrf.mxu1  ;;  %v646_v58 = vadd.f32 %v645_v41, %v633_v54 }
  0xcb   :  { %v649_v63 = vmax.f32 %v448_v61, %v646_v58 }
  0xce   :  { %v634_v49 = vpop.f32.mrf.mxu3 }
  0xd5   :  { %v820_v51 = vpop.f32.mrf.mxu2 }
  0xd6   :  { %v846_v55 = vpop.f32.mrf.mxu3 }
  0xdd   :  { %v822_v60 = vpop.f32.mrf.mxu2 }
  0xde   :  { %v833_v59 = vpop.f32.mrf.mxu0  ;;  %v848_v2 = vpop.f32.mrf.mxu3 }
  0xdf   :  { %v834_v62 = vadd.f32 %v833_v59, %v820_v51 }
  0xe1   :  { %v847_v0 = vadd.f32 %v846_v55, %v834_v62 }
  0xe3   :  { %v850_v3 = vmax.f32 %v649_v63, %v847_v0 }
  0xe5   :  { %v855_v4 = vadd.f32 %v1616_v1, %v850_v3 }
  0xe6   :  { %v835_v5 = vpop.f32.mrf.mxu0 }
  0xe7   :  { %v856_v6 = vmax.f32 %v855_v4, 0.0 }
  0xe9   :  { %v857_v7 = vpack.c.bf16 %v856_v6, %v856_v6 }
  0xeb   :  { %1491 = vmatmul.msk.bf16.vlgmr.msrb.gmra.mxu3 %vm882_vm2, %v857_v7 }
 0x16e   :  { %v899_v17 = vpop.f32.mrf.mxu3 }
 0x16f   :  { %v900_v18 = vadd.f32 %v1617_v16, %v899_v17 }
 0x171   :  { %v903_v20 = vmax.f32 %v900_v18, 0.0 }
 0x173   :  { %v904_v21 = vpack.c.bf16 %v903_v20, %v903_v20 }
 0x175   :  { %1512 = vmatmul.msk.bf16.vlgmr.msra.gmra.mxu1 %vm949_vm4, %v904_v21 }
 0x176   :  { %v901_v22 = vpop.f32.mrf.mxu3 }
 0x1f2   :  { %v962_v25 = vpop.f32.mrf.mxu1 }
 0x1f3   :  { %v963_v26 = vadd.f32 %v1618_v24, %v962_v25 }
 0x1f5   :  { %v966_v27 = vmax.f32 %v963_v26, 0.0 }
 0x1f7   :  { %v967_v28 = vpack.c.bf16 %v966_v27, %v966_v27 }
 0x1f9   :  { %1525 = vmatmul.msk.bf16.vlgmr.msrb.gmra.mxu2 %vm1000_vm5, %v967_v28 }
 0x1fa   :  { %v964_v29 = vpop.f32.mrf.mxu1 }
 0x27c   :  { %v1017_v31 = vpop.f32.mrf.mxu2 }
 0x27d   :  { %v1018_v19 = vadd.f32 %v1619_v30, %v1017_v31 }
 0x27f   :  { %v1022_v32 = vsel %vm1021_vm6, %v1018_v19, -inf }
 0x280   :  { %1023 = vmax.xlane.f32.xlu0 %v1022_v32 }
 0x284   :  { %v1019_v33 = vpop.f32.mrf.mxu2 }
 0x2f3   :  { %v1024_v34 = vpop.xlane.xlu0 %1023 }
 0x2f4   :  { %v1025_v35 = vsub.f32 %v1018_v19, %v1024_v34 }
 0x2f6   :  { %v1026_v36 = vmul.f32 1.442695, %v1025_v35 }
 0x2f8   :  { %1620 = vpow2.f32 %v1026_v36 }
 0x2fe   :  { %v1621_v37 = vpop.eup %1620 }
 0x2ff   :  { %v1028_v38 = vsel %vm1021_vm6, %v1621_v37, 0.0 }
 0x300   :  { %1029 = vadd.xlane.f32.xlu0 %v1028_v38 }
 0x373   :  { %v1030_v39 = vpop.xlane.xlu0 %1029 }
 0x374   :  { %1622 = vlog2.f32 %v1030_v39 }
 0x37a   :  { %v1623_v40 = vpop.eup %1622 }
 0x37b   :  { %v1032_v41 = vmul.f32 0.6931472, %v1623_v40 }
 0x37d   :  { %v1033_v42 = vsub.f32 %v1025_v35, %v1032_v41 }
 0x37f   :  { %1034 = vst.msk [vmem:[%s2005_s9] sm:$0xff] %vm1021_vm6, %v1033_v42 }

</bundles_post_ra>
